<compile_context>
chip_gen: v7x
topology: tpu7x:2x2x1
jax: 0.10.0
libtpu: 0.0.40
codegen_flags: <defaults>
</compile_context>

<pallas_src>
import functools
import math

import jax
import jax.numpy as jnp
from jax.experimental import pallas as pl
from jax.experimental.pallas import tpu as pltpu

_LANES = 128
_SUB_ROWS = 256          # rows per inner compute slice (bounds f32 temporaries)


def _round_up(x, m):
    return (x + m - 1) // m * m


def _auto_num_cores():
    """2 TensorCores only on v7x; v5e/v6e have a single core."""
    try:
        kind = jax.devices()[0].device_kind.lower()
    except Exception:
        return 1
    return 2 if "7" in kind else 1


def _gmof_kernel(has_gt, has_conf, finalize, m_points, d, w, trb, n_sub,
                 sub_rows, rho2_ref, *refs):
    """Accumulates the GMoF partial sums for one (core, step) grid point.

    refs (depending on static flags):
      est_ref  (trb, W*D)      flat, lane-dense rows of W points
      [gt_ref  (trb, W*D)]     if has_gt
      [conf_ref (trb, W)]      if has_conf
      [g_ref   (W*D, W)]       0/1 grouping matrix, if D > 1
      out_ref  (1, 2, W)       per-core result block (written on last step)
      num_acc  (1, W)          VMEM scratch accumulator
      [den_acc (1, W)]         VMEM scratch accumulator, if has_conf
    """
    idx = 0
    est_ref = refs[idx]; idx += 1
    gt_ref = None
    conf_ref = None
    g_ref = None
    if has_gt:
        gt_ref = refs[idx]; idx += 1
    if has_conf:
        conf_ref = refs[idx]; idx += 1
    if d > 1:
        g_ref = refs[idx]; idx += 1
    out_ref = refs[idx]; idx += 1
    num_acc = refs[idx]; idx += 1
    den_acc = refs[idx] if has_conf else None

    core = pl.program_id(0)
    step = pl.program_id(1)
    spc = pl.num_programs(1)

    @pl.when(step == 0)
    def _():
        num_acc[...] = jnp.zeros((1, w), jnp.float32)
        if has_conf:
            den_acc[...] = jnp.zeros((1, w), jnp.float32)

    rho2 = rho2_ref[0]                               # f32 scalar from SMEM
    gmat = g_ref[...] if d > 1 else None             # (R, W) f32, cached in VMEM
    row_start = (core * spc + step) * trb            # nominal first global row

    def accumulate(r0, row0):
        # r0: local row offset inside the block, row0: global row index of r0.
        e = est_ref[pl.ds(r0, sub_rows), :].astype(jnp.float32)      # (sub, R)
        if has_gt:
            e = e - gt_ref[pl.ds(r0, sub_rows), :].astype(jnp.float32)
        y = e * e
        if d > 1:
            # Sum each point's D consecutive coords via the 0/1 grouping matrix
            # on the (idle) MXU.  HIGHEST precision keeps f32 accuracy.
            sq = jnp.dot(y, gmat, preferred_element_type=jnp.float32,
                         precision=jax.lax.Precision.HIGHEST)        # (sub, W)
        else:
            sq = y
        diff = sq / (sq + rho2)                                      # (sub, W)

        # Mask ragged tails / overshoot blocks by the true point count.
        rows = jax.lax.broadcasted_iota(jnp.int32, (sub_rows, w), 0) + row0
        cols = jax.lax.broadcasted_iota(jnp.int32, (sub_rows, w), 1)
        valid = rows * w + cols < m_points

        if has_conf:
            cf = conf_ref[pl.ds(r0, sub_rows), :].astype(jnp.float32)
            num_acc[...] += jnp.sum(jnp.where(valid, diff * cf, 0.0),
                                    axis=0, keepdims=True)
            den_acc[...] += jnp.sum(jnp.where(valid, cf, 0.0),
                                    axis=0, keepdims=True)
        else:
            num_acc[...] += jnp.sum(jnp.where(valid, diff, 0.0),
                                    axis=0, keepdims=True)

    if n_sub == 1:
        accumulate(0, row_start)
    else:
        def body(t, carry):
            r0 = pl.multiple_of(t * sub_rows, sub_rows)
            accumulate(r0, row_start + t * sub_rows)
            return carry
        jax.lax.fori_loop(0, n_sub, body, 0)

    @pl.when(step == spc - 1)
    def _():
        if finalize:
            # Single core: produce the final scalar entirely in-kernel.
            num_s = jnp.sum(num_acc[...])
            if has_conf:
                res = num_s / (1e-05 + jnp.sum(den_acc[...]))
            else:
                res = num_s / jnp.float32(m_points)
            out_ref[...] = jnp.zeros((1, 2, w), jnp.float32) + res
        else:
            out_ref[0, 0:1, :] = num_acc[...]
            out_ref[0, 1:2, :] = (den_acc[...] if has_conf
                                  else jnp.zeros((1, w), jnp.float32))


def gmof(est, gt=None, conf=None, *, rho=1.0, block_rows=2048, num_cores=None):
    """Pallas TPU implementation of GMoF.forward. Returns an f32 scalar."""
    est = jnp.asarray(est)
    d = int(est.shape[-1])
    m = int(est.size // d)                     # number of points (static)
    has_gt = gt is not None
    has_conf = conf is not None

    # --- lane-dense, copy-free layout ---------------------------------------
    w = _LANES // math.gcd(d, _LANES)          # points per row
    r = w * d                                  # row width (multiple of 128)
    n_rows = -(-m // w)
    pad_pts = n_rows * w - m                   # only when M % W != 0

    nc = int(num_cores) if num_cores is not None else _auto_num_cores()
    nc = max(nc, 1)

    # --- tiling: even distribution over cores * steps -----------------------
    cap = max(_round_up(int(block_rows), 8), 8)
    if n_rows <= cap:
        trb, n_blocks, spc = n_rows, 1, 1
    else:
        blocks_min = -(-n_rows // cap)
        spc0 = -(-blocks_min // nc)
        trb = min(_round_up(-(-n_rows // (nc * spc0)), _SUB_ROWS), cap)
        n_blocks = -(-n_rows // trb)
        spc = -(-n_blocks // nc)
    if trb > _SUB_ROWS and trb % _SUB_ROWS == 0:
        n_sub, sub_rows = trb // _SUB_ROWS, _SUB_ROWS
    else:
        n_sub, sub_rows = 1, trb

    def as_rows(x, per_point, row_width):
        flat = jnp.asarray(x).reshape(-1)          # contiguous -> free reshape
        if pad_pts:
            # Needed only to make the free (n_rows, row_width) view valid; the
            # padded values are never trusted (masked in-kernel).
            flat = jnp.pad(flat, (0, pad_pts * per_point))
        return flat.reshape(n_rows, row_width)

    rho2 = (jnp.asarray(rho, dtype=jnp.float32) ** 2).reshape(1)

    def blk(c, i):
        # Clamp so overshoot steps never request a window past the array.
        return (jnp.minimum(c * spc + i, n_blocks - 1), 0)

    inputs = [rho2, as_rows(est, d, r)]
    in_specs = [pl.BlockSpec(memory_space=pltpu.MemorySpace.SMEM),
                pl.BlockSpec((trb, r), blk)]
    if has_gt:
        inputs.append(as_rows(gt, d, r))
        in_specs.append(pl.BlockSpec((trb, r), blk))
    if has_conf:
        inputs.append(as_rows(conf, 1, w))
        in_specs.append(pl.BlockSpec((trb, w), blk))
    if d > 1:
        gmat = (jnp.arange(r, dtype=jnp.int32)[:, None] // d ==
                jnp.arange(w, dtype=jnp.int32)[None, :]).astype(jnp.float32)
        inputs.append(gmat)
        in_specs.append(pl.BlockSpec((r, w), lambda c, i: (0, 0)))

    finalize = (nc == 1)
    out_shape = jax.ShapeDtypeStruct((nc, 2, w), jnp.float32)
    out_spec = pl.BlockSpec((1, 2, w), lambda c, i: (c, 0, 0))

    scratch = [pltpu.VMEM((1, w), jnp.float32)]
    if has_conf:
        scratch.append(pltpu.VMEM((1, w), jnp.float32))

    # Explicit VMEM budget (raises v5e's 16 MiB scoped default; stays well
    # under v7x's 64 MiB physical VMEM).
    esz = est.dtype.itemsize
    gsz = jnp.asarray(gt).dtype.itemsize if has_gt else 0
    csz = jnp.asarray(conf).dtype.itemsize if has_conf else 0
    step_bytes = trb * r * esz + (trb * r * gsz if has_gt else 0) \
        + (trb * w * csz if has_conf else 0) + (r * w * 4 if d > 1 else 0)
    temp_bytes = sub_rows * r * 4 * 6 + sub_rows * w * 4 * 8
    vmem_limit = int(min(max(2 * step_bytes + temp_bytes + (1 << 20),
                             32 * 1024 * 1024), 48 * 1024 * 1024))

    kernel = functools.partial(_gmof_kernel, has_gt, has_conf, finalize,
                               m, d, w, trb, n_sub, sub_rows)
    out = pl.pallas_call(
        kernel,
        out_shape=out_shape,
        grid_spec=pltpu.PrefetchScalarGridSpec(
            num_scalar_prefetch=0,
            grid=(nc, spc),
            in_specs=in_specs,
            out_specs=out_spec,
            scratch_shapes=scratch,
        ),
        compiler_params=pltpu.CompilerParams(
            dimension_semantics=("parallel", "arbitrary"),
            vmem_limit_bytes=vmem_limit),
    )(*inputs)

    if finalize:
        return out[0, 0, 0]
    num = jnp.sum(out[:, 0, :])
    if has_conf:
        return num / (1e-05 + jnp.sum(out[:, 1, :]))
    return num / m


def _gmof_ref(est, gt=None, conf=None, rho=1.0):
    rho2 = float(rho) * float(rho)
    diff0 = est.astype(jnp.float32)
    if gt is not None:
        diff0 = diff0 - gt.astype(jnp.float32)
    sq = jnp.sum(diff0 * diff0, axis=-1)
    diff = sq / (sq + rho2)
    if conf is not None:
        cf = conf.astype(jnp.float32)
        return jnp.sum(diff * cf) / (1e-05 + jnp.sum(cf))
    return jnp.sum(diff) / diff.size


if __name__ == "__main__":
    key = jax.random.PRNGKey(0)
    k1, k2, k3, k4, k5, k6 = jax.random.split(key, 6)

    # Keypoint-style shapes: batch=2, num_joints=64, coords=3; conf per joint.
    est = jax.random.normal(k1, (2, 64, 3), dtype=jnp.float32)
    gt = jax.random.normal(k2, (2, 64, 3), dtype=jnp.float32)
    conf = jax.random.uniform(k3, (2, 64), dtype=jnp.float32)

    cases = [
        ("gt+conf", est, gt, conf, 1.0),
        ("gt_only", est, gt, None, 0.5),
        ("conf_only", est, None, conf, 1.0),
        ("neither", est, None, None, 1.0),
    ]
    for name, e_, g_, c_, rho in cases:
        out = jax.block_until_ready(gmof(e_, g_, c_, rho=rho))
        ref = _gmof_ref(e_, g_, c_, rho=rho)
        assert jnp.allclose(out, ref, rtol=1e-5, atol=1e-6), (name, out, ref)

    # Ragged point count (M = 150, not a multiple of 128) with bf16 inputs:
    # the kernel streams bf16 as-is and upcasts in-kernel.
    est_b = jax.random.normal(k4, (3, 50, 3), dtype=jnp.bfloat16)
    gt_b = (est_b.astype(jnp.float32)
            + 0.1 * jax.random.normal(k5, (3, 50, 3))).astype(jnp.bfloat16)
    out_b = jax.block_until_ready(gmof(est_b, gt_b, None, rho=1.0))
    ref_b = _gmof_ref(est_b, gt_b, None, rho=1.0)
    assert jnp.allclose(out_b, ref_b, rtol=1e-4, atol=1e-5), (out_b, ref_b)

    # Multi-block path with a ragged boundary block, in-kernel tail masking and
    # an explicit 2-"core" grid (v7x-style sharding; serial outer loop here).
    est_l = jax.random.normal(k6, (37, 130, 3), dtype=jnp.float32)   # 4810 pts
    conf_l = jax.random.uniform(k3, (37, 130), dtype=jnp.float32)
    out_l = jax.block_until_ready(
        gmof(est_l, None, conf_l, rho=0.7, block_rows=8, num_cores=2))
    ref_l = _gmof_ref(est_l, None, conf_l, rho=0.7)
    assert jnp.allclose(out_l, ref_l, rtol=1e-5, atol=1e-6), (out_l, ref_l)

    print("KERNEL_OK")
</pallas_src>

<mosaic_0001>
module attributes {stable_mosaic.version = 11 : i64} {
  func.func @_gmof_kernel(%arg0: i32, %arg1: i32, %arg2: memref<1xf32, #tpu.memory_space<smem>>, %arg3: memref<1x384xf32, #tpu.memory_space<vmem>>, %arg4: memref<1x384xf32, #tpu.memory_space<vmem>>, %arg5: memref<1x128xf32, #tpu.memory_space<vmem>>, %arg6: memref<384x128xf32, #tpu.memory_space<vmem>>, %arg7: memref<1x2x128xf32, #tpu.memory_space<vmem>>, %arg8: memref<1x128xf32, #tpu.memory_space<vmem>>, %arg9: memref<1x128xf32, #tpu.memory_space<vmem>>) attributes {dimension_semantics = [#tpu.dimension_semantics<parallel>, #tpu.dimension_semantics<arbitrary>], iteration_bounds = array<i64: 1, 1>, scalar_prefetch = 0 : i64, scratch_operands = 2 : i64, tpu.core_type = #tpu.core_type<tc>, window_params = [{transform_indices = @transform_0, window_bounds = array<i64: 1>}, {transform_indices = @transform_1, window_bounds = array<i64: 1, 384>}, {transform_indices = @transform_2, window_bounds = array<i64: 1, 384>}, {transform_indices = @transform_3, window_bounds = array<i64: 1, 128>}, {pipeline_mode = #tpu.pipeline_mode<synchronous>, transform_indices = @transform_4, window_bounds = array<i64: 384, 128>}, {transform_indices = @transform_5, window_bounds = array<i64: 1, 2, 128>}]} {
    %c0_i32 = arith.constant 0 : i32
    %0 = arith.cmpi eq, %arg1, %c0_i32 : i32
    %1 = arith.extui %0 : i1 to i32
    %c0_i32_0 = arith.constant 0 : i32
    %2 = arith.cmpi ne, %1, %c0_i32_0 : i32
    scf.if %2 {
      %cst_25 = arith.constant 0.000000e+00 : f32
      %44 = vector.broadcast %cst_25 : f32 to vector<1x128xf32>
      %c0_26 = arith.constant 0 : index
      %c0_27 = arith.constant 0 : index
      %45 = vector.load %arg8[%c0_26, %c0_27] : memref<1x128xf32, #tpu.memory_space<vmem>>, vector<1x128xf32>
      tpu.vector_store %arg8[%c0_26, %c0_27], %44 {strides = array<i32>} : memref<1x128xf32, #tpu.memory_space<vmem>>, vector<1x128xf32>,
      %cst_28 = arith.constant 0.000000e+00 : f32
      %46 = vector.broadcast %cst_28 : f32 to vector<1x128xf32>
      %c0_29 = arith.constant 0 : index
      %c0_30 = arith.constant 0 : index
      %47 = vector.load %arg9[%c0_29, %c0_30] : memref<1x128xf32, #tpu.memory_space<vmem>>, vector<1x128xf32>
      tpu.vector_store %arg9[%c0_29, %c0_30], %46 {strides = array<i32>} : memref<1x128xf32, #tpu.memory_space<vmem>>, vector<1x128xf32>,
    } else {
    }
    %c0 = arith.constant 0 : index
    %3 = memref.load %arg2[%c0] : memref<1xf32, #tpu.memory_space<smem>>
    %c0_1 = arith.constant 0 : index
    %c0_2 = arith.constant 0 : index
    %4 = vector.load %arg6[%c0_1, %c0_2] : memref<384x128xf32, #tpu.memory_space<vmem>>, vector<384x128xf32>
    %c1_i32 = arith.constant 1 : i32
    %5 = arith.muli %arg0, %c1_i32 : i32
    %6 = arith.addi %5, %arg1 : i32
    %c1_i32_3 = arith.constant 1 : i32
    %7 = arith.muli %6, %c1_i32_3 : i32
    %c0_4 = arith.constant 0 : index
    %c0_5 = arith.constant 0 : index
    %8 = vector.load %arg3[%c0_4, %c0_5] : memref<1x384xf32, #tpu.memory_space<vmem>>, vector<1x384xf32>
    %c0_6 = arith.constant 0 : index
    %c0_7 = arith.constant 0 : index
    %9 = vector.load %arg4[%c0_6, %c0_7] : memref<1x384xf32, #tpu.memory_space<vmem>>, vector<1x384xf32>
    %10 = arith.subf %8, %9 : vector<1x384xf32>
    %11 = arith.mulf %10, %10 : vector<1x384xf32>
    %cst = arith.constant dense<0.000000e+00> : vector<1x128xf32>
    %12 = tpu.matmul %11, %4, %cst {dimension_numbers = #tpu.dot_dimension_numbers<[1], [0], [0], [1], [0, 0, 1, 1], [], []>, precision = #tpu.contract_precision<fp32>} : vector<1x384xf32>, vector<384x128xf32>, vector<1x128xf32> -> vector<1x128xf32>
    %13 = vector.broadcast %3 : f32 to vector<1x128xf32>
    %14 = arith.addf %12, %13 : vector<1x128xf32>
    %15 = arith.divf %12, %14 : vector<1x128xf32>
    %16 = tpu.iota {dimensions = array<i32: 0>} : vector<1x128xi32>
    %17 = vector.broadcast %7 : i32 to vector<1x128xi32>
    %18 = arith.addi %16, %17 : vector<1x128xi32>
    %19 = tpu.iota {dimensions = array<i32: 1>} : vector<1x128xi32>
    %c128_i32 = arith.constant 128 : i32
    %20 = vector.broadcast %c128_i32 : i32 to vector<1x128xi32>
    %21 = arith.muli %18, %20 : vector<1x128xi32>
    %22 = arith.addi %21, %19 : vector<1x128xi32>
    %c128_i32_8 = arith.constant 128 : i32
    %23 = vector.broadcast %c128_i32_8 : i32 to vector<1x128xi32>
    %24 = arith.cmpi slt, %22, %23 : vector<1x128xi32>
    %c0_9 = arith.constant 0 : index
    %c0_10 = arith.constant 0 : index
    %25 = vector.load %arg5[%c0_9, %c0_10] : memref<1x128xf32, #tpu.memory_space<vmem>>, vector<1x128xf32>
    %c0_11 = arith.constant 0 : index
    %c0_12 = arith.constant 0 : index
    %26 = vector.load %arg8[%c0_11, %c0_12] : memref<1x128xf32, #tpu.memory_space<vmem>>, vector<1x128xf32>
    %27 = arith.mulf %15, %25 : vector<1x128xf32>
    %cst_13 = arith.constant 0.000000e+00 : f32
    %28 = vector.broadcast %cst_13 : f32 to vector<1x128xf32>
    %29 = arith.select %24, %27, %28 : vector<1x128xi1>, vector<1x128xf32>
    %cst_14 = arith.constant dense<0.000000e+00> : vector<128xf32>
    %30 = vector.multi_reduction <add>, %29, %cst_14 [0] : vector<1x128xf32> to vector<128xf32>
    %31 = vector.shape_cast %30 : vector<128xf32> to vector<1x128xf32>
    %32 = arith.addf %26, %31 : vector<1x128xf32>
    %c0_15 = arith.constant 0 : index
    %c0_16 = arith.constant 0 : index
    %33 = vector.load %arg8[%c0_15, %c0_16] : memref<1x128xf32, #tpu.memory_space<vmem>>, vector<1x128xf32>
    tpu.vector_store %arg8[%c0_15, %c0_16], %32 {strides = array<i32>} : memref<1x128xf32, #tpu.memory_space<vmem>>, vector<1x128xf32>,
    %c0_17 = arith.constant 0 : index
    %c0_18 = arith.constant 0 : index
    %34 = vector.load %arg9[%c0_17, %c0_18] : memref<1x128xf32, #tpu.memory_space<vmem>>, vector<1x128xf32>
    %cst_19 = arith.constant 0.000000e+00 : f32
    %35 = vector.broadcast %cst_19 : f32 to vector<1x128xf32>
    %36 = arith.select %24, %25, %35 : vector<1x128xi1>, vector<1x128xf32>
    %cst_20 = arith.constant dense<0.000000e+00> : vector<128xf32>
    %37 = vector.multi_reduction <add>, %36, %cst_20 [0] : vector<1x128xf32> to vector<128xf32>
    %38 = vector.shape_cast %37 : vector<128xf32> to vector<1x128xf32>
    %39 = arith.addf %34, %38 : vector<1x128xf32>
    %c0_21 = arith.constant 0 : index
    %c0_22 = arith.constant 0 : index
    %40 = vector.load %arg9[%c0_21, %c0_22] : memref<1x128xf32, #tpu.memory_space<vmem>>, vector<1x128xf32>
    tpu.vector_store %arg9[%c0_21, %c0_22], %39 {strides = array<i32>} : memref<1x128xf32, #tpu.memory_space<vmem>>, vector<1x128xf32>,
    %c0_i32_23 = arith.constant 0 : i32
    %41 = arith.cmpi eq, %arg1, %c0_i32_23 : i32
    %42 = arith.extui %41 : i1 to i32
    %c0_i32_24 = arith.constant 0 : i32
    %43 = arith.cmpi ne, %42, %c0_i32_24 : i32
    scf.if %43 {
      %c0_25 = arith.constant 0 : index
      %c0_26 = arith.constant 0 : index
      %44 = vector.load %arg8[%c0_25, %c0_26] : memref<1x128xf32, #tpu.memory_space<vmem>>, vector<1x128xf32>
      %45 = vector.shape_cast %44 : vector<1x128xf32> to vector<1x1x128xf32>
      %cst_27 = arith.constant dense<0.000000e+00> : vector<1xf32>
      %46 = vector.multi_reduction <add>, %45, %cst_27 [1, 2] : vector<1x1x128xf32> to vector<1xf32>
      %47 = vector.shape_cast %46 : vector<1xf32> to vector<1x1x1xf32>
      %48 = vector.extract %47[0, 0, 0] : f32 from vector<1x1x1xf32>
      %c0_28 = arith.constant 0 : index
      %c0_29 = arith.constant 0 : index
      %49 = vector.load %arg9[%c0_28, %c0_29] : memref<1x128xf32, #tpu.memory_space<vmem>>, vector<1x128xf32>
      %50 = vector.shape_cast %49 : vector<1x128xf32> to vector<1x1x128xf32>
      %cst_30 = arith.constant dense<0.000000e+00> : vector<1xf32>
      %51 = vector.multi_reduction <add>, %50, %cst_30 [1, 2] : vector<1x1x128xf32> to vector<1xf32>
      %52 = vector.shape_cast %51 : vector<1xf32> to vector<1x1x1xf32>
      %53 = vector.extract %52[0, 0, 0] : f32 from vector<1x1x1xf32>
      %cst_31 = arith.constant 9.99999974E-6 : f32
      %54 = arith.addf %cst_31, %53 : f32
      %55 = arith.divf %48, %54 : f32
      %cst_32 = arith.constant 0.000000e+00 : f32
      %56 = vector.broadcast %cst_32 : f32 to vector<1x2x128xf32>
      %57 = vector.broadcast %55 : f32 to vector<1x2x128xf32>
      %58 = arith.addf %56, %57 : vector<1x2x128xf32>
      %c0_33 = arith.constant 0 : index
      %c0_34 = arith.constant 0 : index
      %c0_35 = arith.constant 0 : index
      %59 = vector.load %arg7[%c0_33, %c0_34, %c0_35] : memref<1x2x128xf32, #tpu.memory_space<vmem>>, vector<1x2x128xf32>
      tpu.vector_store %arg7[%c0_33, %c0_34, %c0_35], %58 {strides = array<i32>} : memref<1x2x128xf32, #tpu.memory_space<vmem>>, vector<1x2x128xf32>,
    } else {
    }
    return
  }
  func.func @transform_0(%arg0: i32, %arg1: i32) -> i32 {
    %c0_i32 = arith.constant 0 : i32
    %c0_i32_0 = arith.constant 0 : i32
    return %c0_i32 : i32
  }
  func.func @transform_1(%arg0: i32, %arg1: i32) -> (i32, i32) {
    %c1_i32 = arith.constant 1 : i32
    %0 = arith.muli %arg0, %c1_i32 : i32
    %1 = arith.addi %0, %arg1 : i32
    %c0_i32 = arith.constant 0 : i32
    %2 = arith.minsi %1, %c0_i32 : i32
    %c0_i32_0 = arith.constant 0 : i32
    %c0_i32_1 = arith.constant 0 : i32
    return %2, %c0_i32_0 : i32, i32
  }
  func.func @transform_2(%arg0: i32, %arg1: i32) -> (i32, i32) {
    %c1_i32 = arith.constant 1 : i32
    %0 = arith.muli %arg0, %c1_i32 : i32
    %1 = arith.addi %0, %arg1 : i32
    %c0_i32 = arith.constant 0 : i32
    %2 = arith.minsi %1, %c0_i32 : i32
    %c0_i32_0 = arith.constant 0 : i32
    %c0_i32_1 = arith.constant 0 : i32
    return %2, %c0_i32_0 : i32, i32
  }
  func.func @transform_3(%arg0: i32, %arg1: i32) -> (i32, i32) {
    %c1_i32 = arith.constant 1 : i32
    %0 = arith.muli %arg0, %c1_i32 : i32
    %1 = arith.addi %0, %arg1 : i32
    %c0_i32 = arith.constant 0 : i32
    %2 = arith.minsi %1, %c0_i32 : i32
    %c0_i32_0 = arith.constant 0 : i32
    %c0_i32_1 = arith.constant 0 : i32
    return %2, %c0_i32_0 : i32, i32
  }
  func.func @transform_4(%arg0: i32, %arg1: i32) -> (i32, i32) {
    %c0_i32 = arith.constant 0 : i32
    %c0_i32_0 = arith.constant 0 : i32
    %c0_i32_1 = arith.constant 0 : i32
    return %c0_i32, %c0_i32_0 : i32, i32
  }
  func.func @transform_5(%arg0: i32, %arg1: i32) -> (i32, i32, i32) {
    %c0_i32 = arith.constant 0 : i32
    %c0_i32_0 = arith.constant 0 : i32
    %c0_i32_1 = arith.constant 0 : i32
    return %arg0, %c0_i32, %c0_i32_0 : i32, i32, i32
  }
}

</mosaic_0001>

<bundles_post_ra>
// kernel: tpu_custom_call.1
= control target key start
LH: loop header
LB: loop body
LE: loop exit
PB: predicated region body
PF: predicated region fallthrough
CT: control target
= control target key end

     0   :  { %11 = vsyncpa [#allocation6], 0  ;;  %s3532_s0 = inlined_call_operand.<no memory space> [shape: f32[1], index: 0, kind: input, shape index: {}]   ;;  %s3533_s1 = inlined_call_operand.vmem [shape: f32[1,384], index: 1, kind: input, shape index: {}]   ;;  %s3534_s2 = inlined_call_operand.vmem [shape: f32[1,384], index: 2, kind: input, shape index: {}]   ;;  %s3535_s3 = inlined_call_operand.vmem [shape: f32[1,128], index: 3, kind: input, shape index: {}]   ;;  %s3536_s4 = inlined_call_operand.hbm [shape: f32[384,128], index: 4, kind: input, shape index: {}]   ;;  %s3537_s5 = inlined_call_operand.hbm [shape: f32[1,2,128], index: 5, kind: output, shape index: {}]  }
   0x1   :  { %12 = vsyncpa [#allocation7], 0  ;;  %s2716_s18 = smov [#allocation5]   ;;  %s2668_s22 = scalar_lea.hbm %s3536_s4, 6144 }
   0x2   :  { %s55_s19 = sshll.u32 %s2716_s18, 4  ;;  %p2669_p0 = scmp.ne.s32.totalorder %s3536_s4, %s2668_s22  ;;  %s56_s19 = int_to_ptr.vmem [resolvable:$true] %s55_s19 }
   0x3   :  { %p2672_p1 = scmp.lt.u32.totalorder %s2668_s22, %s3536_s4 }
   0x5   :  { %p2674_p2 = pnand %p2672_p1, %p2669_p0 }
   0x7   :  { %2677 = shalt.err (!%p2674_p2)
}
   0x8   :  { %s2678_s27 = scalar_lea.vmem %s56_s19, 6144  ;;  %p2683_p4 = scmp.lt.s32.totalorder %s56_s19, %s56_s19 }
   0x9   :  { %p2679_p3 = scmp.ne.s32.totalorder %s56_s19, %s2678_s27  ;;  %p2684_p5 = scmp.lt.s32.totalorder %s2678_s27, %s2678_s27 }
   0xb   :  { %p2685_p6 = por %p2684_p5, %p2683_p4 }
   0xd   :  { %p2686_p7 = pnand %p2685_p6, %p2679_p3 }
   0xf   :  { %2689 = shalt.err (!%p2686_p7)
}
  0x10   :  { %s2717_s28 = smov 128   ;;  %s2718_s29 = smov 8  }
  0x11   :  { %61 = dma.hbm_to_vmem [thread:$0]  %s3536_s4, 6144, %s56_s19, [#allocation6], %s2717_s28, %s2717_s28, %s2718_s29  }
  0x12   :  { %2712 = dma.done.wait [#allocation6], 6144  }
  0x13   :  { %2713 = vsyncadd [#allocation6], 4294961152  ;;  %v3538_v0 = vlaneseq  ;;  %v3547_v1 = vmov 0.0|0.0   ;;  %vm2720_vm0 = vmmov 0   ;;  %v3539_v2 = vmov 0.0   ;;  %v137_v4 = vld [vmem:[#allocation5 + $0x80] sm:$0xff] }
  0x14   :  { %2496 = vmatprep.subr.bf16.mxu0 %v3547_v1  ;;  %2126 = vmatprep.mubr.msk.f32.mxu0 %vm2720_vm0, %v3539_v2  ;;  %118 = vst [vmem:[#allocation2] sm:$0x1] %v3539_v2  ;;  %119 = vst [vmem:[#allocation3] sm:$0x1] %v3539_v2  ;;  %v138_v5 = vld [vmem:[#allocation5 + $0x88] sm:$0xff]  ;;  %v153_v6 = vld [vmem:[#allocation5 + $0x100] sm:$0xff] }
  0x15   :  { %v2771_v3 = vshrl.u32 %v3538_v0, 7  ;;  %v239_v10 = vand.u32 4294901760, %v137_v4  ;;  %v242_v11 = vand.u32 4294901760, %v138_v5  ;;  %v154_v12 = vld [vmem:[#allocation5 + $0x108] sm:$0xff]  ;;  %v1053_v13 = vand.u32 4294901760, %v153_v6  ;;  %v121_v14 = vld [vmem:[#allocation5] sm:$0xff] }
  0x16   :  { %v122_v15 = vld [vmem:[#allocation5 + $0x8] sm:$0xff]  ;;  %v1056_v16 = vand.u32 4294901760, %v154_v12  ;;  %v191_v17 = vand.u32 4294901760, %v121_v14  ;;  %v139_v19 = vld [vmem:[#allocation5 + $0x90] sm:$0xff]  ;;  %v140_v20 = vld [vmem:[#allocation5 + $0x98] sm:$0xff]  ;;  %vm1722_vm2 = vcmask 1040384  }
  0x17   :  { %3666 = vst [vmem:[#allocation11_spill] sm:$0xff] %v2771_v3  ;;  %v194_v18 = vand.u32 4294901760, %v122_v15  ;;  %v155_v21 = vld [vmem:[#allocation5 + $0x110] sm:$0xff]  ;;  %v2776_v22 = vpack.c.bf16 %v242_v11, %v239_v10  ;;  %v2778_v23 = vsub.f32 %v137_v4, %v239_v10  ;;  %v2780_v24 = vsub.f32 %v138_v5, %v242_v11  ;;  %v156_v26 = vld [vmem:[#allocation5 + $0x118] sm:$0xff]  ;;  %v141_v33 = vld [vmem:[#allocation5 + $0xa0] sm:$0xff]  ;;  %s2722_s13 = smov [#allocation8]  }
  0x18   :  { %v2782_v25 = vsub.f32 %v153_v6, %v1053_v13  ;;  %v123_v27 = vld [vmem:[#allocation5 + $0x10] sm:$0xff]  ;;  %v124_v28 = vld [vmem:[#allocation5 + $0x18] sm:$0xff]  ;;  %v2784_v29 = vpack.c.bf16 %v1056_v16, %v1053_v13  ;;  %v2786_v30 = vsub.f32 %v154_v12, %v1056_v16  ;;  %v2790_v32 = vsub.f32 %v121_v14, %v191_v17  ;;  %v142_v38 = vld [vmem:[#allocation5 + $0xa8] sm:$0xff]  ;;  %s1758_s14 = sshll.u32 %s2722_s13, 4  ;;  %s1759_s14 = int_to_ptr.vmem [resolvable:$true] %s1758_s14 }
  0x19   :  { %3667 = vst [vmem:[#allocation12_spill] sm:$0xff] %v2776_v22  ;;  %v2788_v31 = vpack.c.bf16 %v194_v18, %v191_v17  ;;  %2305 = vmatprep.subr.bf16.mxu1 %v2776_v22  ;;  %v2793_v34 = vsub.f32 %v122_v15, %v194_v18  ;;  %v245_v35 = vand.u32 4294901760, %v139_v19  ;;  %v248_v36 = vand.u32 4294901760, %v140_v20  ;;  %v157_v43 = vld [vmem:[#allocation5 + $0x120] sm:$0xff]  ;;  %v158_v44 = vld [vmem:[#allocation5 + $0x128] sm:$0xff]  ;;  %v143_v51 = vld [vmem:[#allocation5 + $0xb0] sm:$0xff]  ;;  %p2695_p9 = scmp.lt.s32.totalorder %s1759_s14, %s1759_s14 }
  0x1a   :  { %3668 = vst [vmem:[#allocation13_spill] sm:$0xff] %v2782_v25  ;;  %3669 = vst [vmem:[#allocation14_spill] sm:$0xff] %v2784_v29  ;;  %v1059_v37 = vand.u32 4294901760, %v155_v21  ;;  %2498 = vmatpush3.bf16.msra.mxu0 %v2784_v29  ;;  %v1062_v39 = vand.u32 4294901760, %v156_v26  ;;  %v197_v40 = vand.u32 4294901760, %v123_v27  ;;  %v200_v41 = vand.u32 4294901760, %v124_v28 }
  0x1b   :  { %3670 = vst [vmem:[#allocation15_spill] sm:$0xff] %v2786_v30  ;;  %3671 = vst [vmem:[#allocation16_spill] sm:$0xff] %v2788_v31  ;;  %2307 = vmatpush3.bf16.msra.mxu1 %v2788_v31  ;;  %v251_v42 = vand.u32 4294901760, %v141_v33  ;;  %2499 = vmatprep.subr.bf16.mxu0 %v3547_v1  ;;  %v2798_v45 = vpack.c.bf16 %v248_v36, %v245_v35  ;;  %v2800_v46 = vsub.f32 %v139_v19, %v245_v35  ;;  %v125_v49 = vld [vmem:[#allocation5 + $0x20] sm:$0xff]  ;;  %v126_v50 = vld [vmem:[#allocation5 + $0x28] sm:$0xff]  ;;  %s2690_s17 = scalar_lea.vmem %s1759_s14, 32 }
  0x1c   :  { %3672 = vst [vmem:[#allocation17_spill] sm:$0xff] %v2790_v32  ;;  %v2802_v47 = vsub.f32 %v140_v20, %v248_v36  ;;  %v2804_v48 = vsub.f32 %v155_v21, %v1059_v37  ;;  %v2806_v52 = vpack.c.bf16 %v1062_v39, %v1059_v37  ;;  %v2808_v53 = vsub.f32 %v156_v26, %v1062_v39  ;;  %v144_v56 = vld [vmem:[#allocation5 + $0xb8] sm:$0xff]  ;;  %v159_v5 = vld [vmem:[#allocation5 + $0x130] sm:$0xff]  ;;  %v145_v16 = vld [vmem:[#allocation5 + $0xc0] sm:$0xff]  ;;  %p2691_p8 = scmp.ne.s32.totalorder %s1759_s14, %s2690_s17  ;;  %p2696_p10 = scmp.lt.s32.totalorder %s2690_s17, %s2690_s17 }
  0x1d   :  { %3673 = vst [vmem:[#allocation18_spill] sm:$0xff] %v2798_v45  ;;  %v2810_v54 = vpack.c.bf16 %v200_v41, %v197_v40  ;;  %v2812_v55 = vsub.f32 %v123_v27, %v197_v40  ;;  %2309 = vmatprep.subr.bf16.mxu1 %v2798_v45  ;;  %v2815_v57 = vsub.f32 %v124_v28, %v200_v41  ;;  %v254_v58 = vand.u32 4294901760, %v142_v38  ;;  %v160_v6 = vld [vmem:[#allocation5 + $0x138] sm:$0xff]  ;;  %v127_v14 = vld [vmem:[#allocation5 + $0x30] sm:$0xff]  ;;  %v146_v21 = vld [vmem:[#allocation5 + $0xc8] sm:$0xff] }
  0x1e   :  { %3674 = vst [vmem:[#allocation19_spill] sm:$0xff] %v2806_v52  ;;  %v2817_v59 = vsub.f32 %v141_v33, %v251_v42  ;;  %v1065_v60 = vand.u32 4294901760, %v157_v43  ;;  %2501 = vmatpush3.bf16.msra.mxu0 %v2806_v52  ;;  %v1068_v61 = vand.u32 4294901760, %v158_v44  ;;  %v203_v62 = vand.u32 4294901760, %v125_v49  ;;  %v128_v15 = vld [vmem:[#allocation5 + $0x38] sm:$0xff]  ;;  %v161_v26 = vld [vmem:[#allocation5 + $0x140] sm:$0xff]  ;;  %p2697_p11 = por %p2696_p10, %p2695_p9 }
  0x1f   :  { %3675 = vst [vmem:[#allocation20_spill] sm:$0xff] %v2810_v54  ;;  %2311 = vmatpush3.bf16.msra.mxu1 %v2810_v54  ;;  %v206_v63 = vand.u32 4294901760, %v126_v50  ;;  %v257_v4 = vand.u32 4294901760, %v143_v51  ;;  %2502 = vmatprep.subr.bf16.mxu0 %v3547_v1  ;;  %v2822_v10 = vpack.c.bf16 %v254_v58, %v251_v42  ;;  %v2824_v11 = vsub.f32 %v142_v38, %v254_v58  ;;  %v162_v27 = vld [vmem:[#allocation5 + $0x148] sm:$0xff]  ;;  %v163_v2 = vld [vmem:[#allocation5 + $0x150] sm:$0xff]  ;;  %v164_v9 = vld [vmem:[#allocation5 + $0x158] sm:$0xff] }
  0x20   :  { %v2826_v12 = vsub.f32 %v157_v43, %v1065_v60  ;;  %v260_v13 = vand.u32 4294901760, %v144_v56  ;;  %v2828_v17 = vpack.c.bf16 %v1068_v61, %v1065_v60  ;;  %v2830_v18 = vsub.f32 %v158_v44, %v1068_v61  ;;  %v130_v60 = vld [vmem:[#allocation5 + $0x48] sm:$0xff]  ;;  %v147_v61 = vld [vmem:[#allocation5 + $0xd0] sm:$0xff]  ;;  %v168_v31 = vld [vmem:[#allocation5 + $0x178] sm:$0xff]  ;;  %p2698_p12 = pnand %p2697_p11, %p2691_p8 }
  0x21   :  { %3676 = vst [vmem:[#allocation21_spill] sm:$0xff] %v2822_v10  ;;  %v2832_v19 = vpack.c.bf16 %v206_v63, %v203_v62  ;;  %v2834_v20 = vsub.f32 %v125_v49, %v203_v62  ;;  %2313 = vmatprep.subr.bf16.mxu1 %v2822_v10  ;;  %v2837_v28 = vsub.f32 %v126_v50, %v206_v63  ;;  %v1071_v37 = vand.u32 4294901760, %v159_v5  ;;  %v129_v49 = vld [vmem:[#allocation5 + $0x40] sm:$0xff]  ;;  %v148_v62 = vld [vmem:[#allocation5 + $0xd8] sm:$0xff]  ;;  %v131_v8 = vld [vmem:[#allocation5 + $0x50] sm:$0xff] }
  0x22   :  { %3677 = vst [vmem:[#allocation22_spill] sm:$0xff] %v2828_v17  ;;  %v2839_v33 = vpack.c.bf16 %v260_v13, %v257_v4  ;;  %v2841_v35 = vsub.f32 %v143_v51, %v257_v4  ;;  %v2843_v36 = vsub.f32 %v144_v56, %v260_v13  ;;  %2504 = vmatpush3.bf16.msra.mxu0 %v2828_v17  ;;  %v1074_v38 = vand.u32 4294901760, %v160_v6  ;;  %v151_v45 = vld [vmem:[#allocation5 + $0xf0] sm:$0xff] }
  0x23   :  { %3678 = vst [vmem:[#allocation23_spill] sm:$0xff] %v2832_v19  ;;  %2315 = vmatpush3.bf16.msra.mxu1 %v2832_v19  ;;  %v209_v39 = vand.u32 4294901760, %v127_v14  ;;  %v212_v40 = vand.u32 4294901760, %v128_v15  ;;  %2505 = vmatprep.subr.bf16.mxu0 %v3547_v1  ;;  %v263_v41 = vand.u32 4294901760, %v145_v16  ;;  %v266_v42 = vand.u32 4294901760, %v146_v21  ;;  %v134_v19 = vld [vmem:[#allocation5 + $0x68] sm:$0xff] }
  0x24   :  { %3679 = vst [vmem:[#allocation24_spill] sm:$0xff] %v2839_v33  ;;  %2317 = vmatprep.subr.bf16.mxu1 %v2839_v33  ;;  %v1077_v43 = vand.u32 4294901760, %v161_v26  ;;  %v1080_v44 = vand.u32 4294901760, %v162_v27  ;;  %v2849_v50 = vpack.c.bf16 %v1074_v38, %v1071_v37  ;;  %v2851_v51 = vsub.f32 %v159_v5, %v1071_v37  ;;  %v135_v29 = vld [vmem:[#allocation5 + $0x70] sm:$0xff] }
  0x25   :  { %v2853_v56 = vsub.f32 %v160_v6, %v1074_v38  ;;  %v2855_v58 = vpack.c.bf16 %v212_v40, %v209_v39  ;;  %v2857_v63 = vsub.f32 %v127_v14, %v209_v39  ;;  %v2859_v4 = vsub.f32 %v128_v15, %v212_v40  ;;  %v132_v40 = vld [vmem:[#allocation5 + $0x58] sm:$0xff] }
  0x26   :  { %3680 = vst [vmem:[#allocation25_spill] sm:$0xff] %v2849_v50  ;;  %v2861_v13 = vpack.c.bf16 %v266_v42, %v263_v41  ;;  %v2863_v0 = vsub.f32 %v145_v16, %v263_v41  ;;  %2507 = vmatpush3.bf16.msra.mxu0 %v2849_v50  ;;  %v2867_v5 = vsub.f32 %v146_v21, %v266_v42  ;;  %v215_v14 = vand.u32 4294901760, %v129_v49  ;;  %v150_v50 = vld [vmem:[#allocation5 + $0xe8] sm:$0xff] }
  0x27   :  { %3681 = vst [vmem:[#allocation26_spill] sm:$0xff] %v2855_v58  ;;  %2319 = vmatpush3.bf16.msra.mxu1 %v2855_v58  ;;  %v2869_v6 = vpack.c.bf16 %v1080_v44, %v1077_v43  ;;  %v2871_v37 = vsub.f32 %v161_v26, %v1077_v43  ;;  %2508 = vmatprep.subr.bf16.mxu0 %v3547_v1  ;;  %v218_v16 = vand.u32 4294901760, %v130_v60  ;;  %v269_v38 = vand.u32 4294901760, %v147_v61  ;;  %v149_v58 = vld [vmem:[#allocation5 + $0xe0] sm:$0xff] }
  0x28   :  { %3682 = vst [vmem:[#allocation27_spill] sm:$0xff] %v2861_v13  ;;  %2321 = vmatprep.subr.bf16.mxu1 %v2861_v13  ;;  %v2875_v15 = vsub.f32 %v162_v27, %v1080_v44  ;;  %v272_v39 = vand.u32 4294901760, %v148_v62  ;;  %v2877_v41 = vsub.f32 %v129_v49, %v215_v14  ;;  %v1083_v7 = vand.u32 4294901760, %v163_v2  ;;  %v165_v26 = vld [vmem:[#allocation5 + $0x160] sm:$0xff]  ;;  %v166_v44 = vld [vmem:[#allocation5 + $0x168] sm:$0xff] }
  0x29   :  { %3683 = vst [vmem:[#allocation28_spill] sm:$0xff] %v2869_v6  ;;  %v1086_v21 = vand.u32 4294901760, %v164_v9  ;;  %v221_v42 = vand.u32 4294901760, %v131_v8  ;;  %v2879_v43 = vpack.c.bf16 %v218_v16, %v215_v14  ;;  %v2881_v33 = vsub.f32 %v130_v60, %v218_v16  ;;  %v133_v13 = vld [vmem:[#allocation5 + $0x60] sm:$0xff] }
  0x2a   :  { %v2883_v1 = vpack.c.bf16 %v272_v39, %v269_v38  ;;  %v2885_v27 = vsub.f32 %v147_v61, %v269_v38  ;;  %2510 = vmatpush3.bf16.msra.mxu0 %v2869_v6  ;;  %v2888_v49 = vsub.f32 %v148_v62, %v272_v39  ;;  %v2892_v10 = vsub.f32 %v163_v2, %v1083_v7  ;;  %v152_v2 = vld [vmem:[#allocation5 + $0xf8] sm:$0xff] }
  0x2b   :  { %3684 = vst [vmem:[#allocation29_spill] sm:$0xff] %v2879_v43  ;;  %v2890_v17 = vpack.c.bf16 %v1086_v21, %v1083_v7  ;;  %v2894_v54 = vsub.f32 %v164_v9, %v1086_v21  ;;  %2323 = vmatpush3.bf16.msra.mxu1 %v2879_v43  ;;  %v3688_v60 = vmov 0.0|0.0   ;;  %v224_v14 = vand.u32 4294901760, %v132_v40 }
  0x2c   :  { %3685 = vst [vmem:[#allocation30_spill] sm:$0xff] %v2883_v1  ;;  %2511 = vmatprep.subr.bf16.mxu0 %v3688_v60  ;;  %v2898_v61 = vsub.f32 %v131_v8, %v221_v42  ;;  %v275_v16 = vand.u32 4294901760, %v149_v58  ;;  %v278_v38 = vand.u32 4294901760, %v150_v50  ;;  %2325 = vmatprep.subr.bf16.mxu1 %v2883_v1  ;;  %v1089_v6 = vand.u32 4294901760, %v165_v26  ;;  %v167_v8 = vld [vmem:[#allocation5 + $0x170] sm:$0xff] }
  0x2d   :  { %3686 = vst [vmem:[#allocation31_spill] sm:$0xff] %v2890_v17  ;;  %3687 = vst [vmem:[#allocation32_spill] sm:$0xff] %v2894_v54  ;;  %v1092_v62 = vand.u32 4294901760, %v166_v44  ;;  %v227_v39 = vand.u32 4294901760, %v133_v13  ;;  %v230_v52 = vand.u32 4294901760, %v134_v19  ;;  %v2901_v7 = vpack.c.bf16 %v224_v14, %v221_v42  ;;  %v136_v42 = vld [vmem:[#allocation5 + $0x78] sm:$0xff] }
  0x2e   :  { %3689 = vst [vmem:[#allocation33_spill] sm:$0xff] %v2898_v61  ;;  %v2903_v9 = vsub.f32 %v132_v40, %v224_v14  ;;  %v2905_v21 = vpack.c.bf16 %v278_v38, %v275_v16  ;;  %v2907_v43 = vsub.f32 %v149_v58, %v275_v16  ;;  %2513 = vmatpush3.bf16.msra.mxu0 %v2890_v17  ;;  %v170_v40 = vld [vmem:[%s3533_s1] sm:$0x7]  ;;  %v1095_v16 = vand.u32 4294901760, %v167_v8 }
  0x2f   :  { %3690 = vst [vmem:[#allocation34_spill] sm:$0xff] %v2901_v7  ;;  %v2910_v1 = vsub.f32 %v150_v50, %v278_v38  ;;  %v2912_v22 = vpack.c.bf16 %v1092_v62, %v1089_v6  ;;  %v2914_v61 = vsub.f32 %v165_v26, %v1089_v6  ;;  %v2916_v54 = vsub.f32 %v166_v44, %v1092_v62  ;;  %v171_v58 = vld [vmem:[%s3534_s2] sm:$0x7] }
  0x30   :  { %3691 = vst [vmem:[#allocation35_spill] sm:$0xff] %v2905_v21  ;;  %2327 = vmatpush3.bf16.msra.mxu1 %v2901_v7  ;;  %2514 = vmatprep.subr.bf16.mxu0 %v3688_v60  ;;  %v2926_v50 = vpack.c.bf16 %v230_v52, %v227_v39  ;;  %v2928_v14 = vsub.f32 %v133_v13, %v227_v39  ;;  %v281_v26 = vand.u32 4294901760, %v151_v45  ;;  %v284_v44 = vand.u32 4294901760, %v152_v2 }
  0x31   :  { %3692 = vst [vmem:[#allocation36_spill] sm:$0xff] %v2910_v1  ;;  %3693 = vst [vmem:[#allocation37_spill] sm:$0xff] %v2912_v22  ;;  %v2930_v6 = vsub.f32 %v134_v19, %v230_v52  ;;  %2329 = vmatprep.subr.bf16.mxu1 %v2905_v21  ;;  %v1098_v38 = vand.u32 4294901760, %v168_v31  ;;  %v233_v62 = vand.u32 4294901760, %v135_v29  ;;  %v3584_v7 = vand.u32 4294901760, %v2778_v23 }
  0x32   :  { %3694 = vst [vmem:[#allocation38_spill] sm:$0xff] %v2914_v61  ;;  %3695 = vst [vmem:[#allocation39_spill] sm:$0xff] %v2916_v54  ;;  %v2933_v17 = vsub.f32 %v151_v45, %v281_v26  ;;  %v236_v54 = vand.u32 4294901760, %v136_v42  ;;  %v172_v61 = vsub.f32 %v170_v40, %v171_v58  ;;  %2516 = vmatpush3.bf16.msra.mxu0 %v2912_v22  ;;  %v3587_v58 = vand.u32 4294901760, %v2780_v24 }
  0x33   :  { %3696 = vst [vmem:[#allocation40_spill] sm:$0xff] %v2926_v50  ;;  %3697 = vst [vmem:[#allocation41_spill] sm:$0xff] %v2928_v14  ;;  %v2937_v1 = vpack.c.bf16 %v284_v44, %v281_v26  ;;  %v2939_v13 = vsub.f32 %v152_v2, %v284_v44  ;;  %v2941_v52 = vpack.c.bf16 %v1098_v38, %v1095_v16  ;;  %2517 = vmatprep.subr.bf16.mxu0 %v3688_v60 }
  0x34   :  { %v2943_v19 = vsub.f32 %v167_v8, %v1095_v16  ;;  %2331 = vmatpush3.bf16.msra.mxu1 %v2926_v50  ;;  %v2947_v45 = vsub.f32 %v168_v31, %v1098_v38  ;;  %v2949_v39 = vpack.c.bf16 %v236_v54, %v233_v62  ;;  %v2951_v40 = vsub.f32 %v135_v29, %v233_v62 }
  0x35   :  { %3698 = vst [vmem:[#allocation42_spill] sm:$0xff] %v2937_v1  ;;  %3699 = vst [vmem:[#allocation43_spill] sm:$0xff] %v2941_v52  ;;  %2333 = vmatprep.subr.bf16.mxu1 %v2937_v1  ;;  %v2955_v2 = vsub.f32 %v136_v42, %v236_v54  ;;  %v173_v26 = vmul.f32 %v172_v61, %v172_v61  ;;  %v418_v8 = vsub.f32 %v2778_v23, %v3584_v7 }
  0x36   :  { %3700 = vst [vmem:[#allocation44_spill] sm:$0xff] %v2949_v39  ;;  %v425_v31 = vsub.f32 %v2780_v24, %v3587_v58  ;;  %v3597_v29 = vand.u32 4294901760, %v2786_v30  ;;  %2519 = vmatpush3.bf16.msra.mxu0 %v2941_v52  ;;  %v3702_v54 = vsub.s32 1, %v2771_v3  ;;  %v3703_v42 = vsub.s32 0, %v2771_v3 }
  0x37   :  { %3701 = vst [vmem:[#allocation45_spill] sm:$0xff] %v2955_v2  ;;  %v419_v7 = vand.u32 4294901760, %v418_v8  ;;  %v3704_v44 = vsub.s32 2, %v2771_v3  ;;  %2520 = vmatprep.subr.bf16.mxu0 %v3688_v60  ;;  %v3705_v16 = vand.u32 4294901760, %v2782_v25  ;;  %v3706_v52 = vand.u32 4294901760, %v2790_v32 }
  0x38   :  { %v182_v61 = vrot.slane %v173_v26, %v3702_v54  ;;  %v178_v62 = vrot.slane %v173_v26, %v3703_v42  ;;  %2335 = vmatpush3.bf16.msra.mxu1 %v2949_v39  ;;  %v426_v58 = vand.u32 4294901760, %v425_v31  ;;  %v1154_v54 = vsub.f32 %v2786_v30, %v3597_v29 }
  0x39   :  { %v186_v1 = vrot.slane %v173_v26, %v3704_v44  ;;  %v1147_v38 = vsub.f32 %v2782_v25, %v3705_v16  ;;  %v306_v8 = vsub.f32 %v2790_v32, %v3706_v52  ;;  %v3710_v31 = vand.u32 4294901760, %v2793_v34 }
  0x3a   :  { %v2985_v42 = vand.u32 4294901760, %v182_v61  ;;  %v2987_v26 = vand.u32 4294901760, %v178_v62  ;;  %v2336_v39 = vpack.c.bf16 %v426_v58, %v419_v7  ;;  %v1155_v50 = vand.u32 4294901760, %v1154_v54 }
  0x3b   :  { %v2989_v44 = vand.u32 4294901760, %v186_v1  ;;  %v313_v3 = vsub.f32 %v2793_v34, %v3710_v31  ;;  %v1148_v16 = vand.u32 4294901760, %v1147_v38  ;;  %v307_v22 = vand.u32 4294901760, %v306_v8 }
  0x3c   :  { %3707 = vst [vmem:[#allocation46_spill] sm:$0xff] %v2985_v42  ;;  %3708 = vst [vmem:[#allocation47_spill] sm:$0xff] %v2987_v26  ;;  %v2995_v29 = vsub.f32 %v182_v61, %v2985_v42  ;;  %v2998_v21 = vsub.f32 %v178_v62, %v2987_v26  ;;  %2337 = vmatprep.subr.bf16.mxu1 %v2336_v39  ;;  %v3607_v25 = vand.u32 4294901760, %v2800_v46  ;;  %v3606_v31 = vand.u32 4294901760, %v2802_v47 }
  0x3d   :  { %3709 = vst [vmem:[#allocation48_spill] sm:$0xff] %v2989_v44  ;;  %v3001_v52 = vsub.f32 %v186_v1, %v2989_v44  ;;  %v314_v32 = vand.u32 4294901760, %v313_v3  ;;  %v2521_v30 = vpack.c.bf16 %v1155_v50, %v1148_v16  ;;  %v3608_v7 = vand.u32 4294901760, %v2804_v48 }
  0x3e   :  { %3711 = vst [vmem:[#allocation49_spill] sm:$0xff] %v2995_v29  ;;  %3712 = vst [vmem:[#allocation50_spill] sm:$0xff] %v2998_v21  ;;  %v3613_v58 = vand.u32 4294901760, %v2995_v29  ;;  %v3614_v38 = vand.u32 4294901760, %v2998_v21  ;;  %v432_v1 = vsub.f32 %v2800_v46, %v3607_v25  ;;  %v439_v3 = vsub.f32 %v2802_v47, %v3606_v31 }
  0x3f   :  { %3713 = vst [vmem:[#allocation51_spill] sm:$0xff] %v3001_v52  ;;  %v3619_v61 = vand.u32 4294901760, %v3001_v52  ;;  %v2338_v62 = vpack.c.bf16 %v314_v32, %v307_v22  ;;  %v1161_v50 = vsub.f32 %v2804_v48, %v3608_v7  ;;  %v3644_v39 = vand.u32 4294901760, %v2808_v53 }
  0x40   :  { %v289_v54 = vsub.f32 %v2995_v29, %v3613_v58  ;;  %v295_v22 = vsub.f32 %v2998_v21, %v3614_v38  ;;  %v3636_v8 = vand.u32 4294901760, %v2812_v55  ;;  %v433_v16 = vand.u32 4294901760, %v432_v1 }
  0x41   :  { %v1136_v32 = vsub.f32 %v3001_v52, %v3619_v61  ;;  %v440_v31 = vand.u32 4294901760, %v439_v3  ;;  %v1162_v25 = vand.u32 4294901760, %v1161_v50  ;;  %v1168_v7 = vsub.f32 %v2808_v53, %v3644_v39 }
  0x42   :  { %v290_v26 = vand.u32 4294901760, %v289_v54  ;;  %v296_v44 = vand.u32 4294901760, %v295_v22  ;;  %v320_v38 = vsub.f32 %v2812_v55, %v3636_v8  ;;  %v3627_v61 = vand.u32 4294901760, %v2815_v57 }
  0x43   :  { %v1137_v58 = vand.u32 4294901760, %v1136_v32  ;;  %v2340_v21 = vpack.c.bf16 %v440_v31, %v433_v16  ;;  %v1169_v29 = vand.u32 4294901760, %v1168_v7  ;;  %v3625_v52 = vand.u32 4294901760, %v2817_v59 }
  0x44   :  { %291 = vmatprep.mubr.f32.mxu1 %v290_v26  ;;  %v321_v1 = vand.u32 4294901760, %v320_v38  ;;  %v3622_v3 = vand.u32 4294901760, %v2824_v11  ;;  %v3623_v50 = vand.u32 4294901760, %v2826_v12  ;;  %v3624_v54 = vand.u32 4294901760, %v2830_v18 }
  0x45   :  { %2127 = vmatmul.mubr.f32.vlgmr.msra.gmra.mrb[0].mxu0 %v1137_v58  ;;  %297 = vmatmul.mubr.f32.vlgmr.msra.gmra.mrb[0].mxu1 %v296_v44  ;;  %v2524_v22 = vpack.c.bf16 %v1169_v29, %v1162_v25  ;;  %v327_v31 = vsub.f32 %v2815_v57, %v3627_v61  ;;  %v446_v7 = vsub.f32 %v2817_v59, %v3625_v52  ;;  %v3626_v26 = vand.u32 4294901760, %v2834_v20 }
  0x46   :  { %2522 = vmatpush3.bf16.msra.mxu0 %v2521_v30  ;;  %2339 = vmatpush3.bf16.msra.mxu1 %v2338_v62  ;;  %v453_v58 = vsub.f32 %v2824_v11, %v3622_v3  ;;  %v1175_v25 = vsub.f32 %v2826_v12, %v3623_v50  ;;  %v1182_v30 = vsub.f32 %v2830_v18, %v3624_v54  ;;  %v3628_v29 = vand.u32 4294901760, %v2837_v28 }
  0x47   :  { %2523 = vmatprep.subr.bf16.mxu0 %v3688_v60  ;;  %2341 = vmatprep.subr.bf16.mxu1 %v2340_v21  ;;  %v328_v44 = vand.u32 4294901760, %v327_v31  ;;  %v447_v38 = vand.u32 4294901760, %v446_v7  ;;  %v334_v62 = vsub.f32 %v2834_v20, %v3626_v26  ;;  %v3634_v32 = vand.u32 4294901760, %v2841_v35 }
  0x48   :  { %527 = vmatprep.mubr.f32.mxu1 %v2985_v42  ;;  %v454_v16 = vand.u32 4294901760, %v453_v58  ;;  %v1176_v3 = vand.u32 4294901760, %v1175_v25  ;;  %v1183_v50 = vand.u32 4294901760, %v1182_v30  ;;  %v341_v54 = vsub.f32 %v2837_v28, %v3628_v29 }
  0x49   :  { %v3714_v52 = vmov 0.0   ;;  %v2342_v21 = vpack.c.bf16 %v328_v44, %v321_v1  ;;  %v335_v31 = vand.u32 4294901760, %v334_v62  ;;  %v460_v7 = vsub.f32 %v2841_v35, %v3634_v32 }
  0x4a   :  { %2161 = vmatprep.mubr.msk.f32.mxu0 %vm2720_vm0, %v3714_v52  ;;  %2525 = vmatpush3.bf16.msra.mxu0 %v2524_v22  ;;  %v3632_v26 = vand.u32 4294901760, %v2843_v36  ;;  %v2344_v58 = vpack.c.bf16 %v454_v16, %v447_v38  ;;  %v2527_v25 = vpack.c.bf16 %v1183_v50, %v1176_v3  ;;  %v342_v30 = vand.u32 4294901760, %v341_v54 }
  0x4b   :  { %2526 = vmatprep.subr.bf16.mxu0 %v3688_v60  ;;  %v3630_v61 = vand.u32 4294901760, %v2851_v51  ;;  %2343 = vmatpush3.bf16.msra.mxu1 %v2342_v21  ;;  %v461_v29 = vand.u32 4294901760, %v460_v7  ;;  %v3629_v22 = vand.u32 4294901760, %v2853_v56  ;;  %v3631_v44 = vand.u32 4294901760, %v2857_v63 }
  0x4c   :  { %v467_v1 = vsub.f32 %v2843_v36, %v3632_v26  ;;  %2345 = vmatprep.subr.bf16.mxu1 %v2344_v58  ;;  %v2346_v62 = vpack.c.bf16 %v342_v30, %v335_v31  ;;  %v3633_v3 = vand.u32 4294901760, %v2859_v4  ;;  %v3635_v50 = vand.u32 4294901760, %v2863_v0 }
  0x4d   :  { %v1189_v38 = vsub.f32 %v2851_v51, %v3630_v61  ;;  %v1196_v16 = vsub.f32 %v2853_v56, %v3629_v22  ;;  %v348_v21 = vsub.f32 %v2857_v63, %v3631_v44  ;;  %v3642_v31 = vand.u32 4294901760, %v2867_v5 }
  0x4e   :  { %2528 = vmatpush3.bf16.msra.mxu0 %v2527_v25  ;;  %v468_v54 = vand.u32 4294901760, %v467_v1  ;;  %v355_v58 = vsub.f32 %v2859_v4, %v3633_v3  ;;  %v474_v25 = vsub.f32 %v2863_v0, %v3635_v50  ;;  %v3640_v30 = vand.u32 4294901760, %v2871_v37 }
  0x4f   :  { %2529 = vmatprep.subr.bf16.mxu0 %v3688_v60  ;;  %v1190_v7 = vand.u32 4294901760, %v1189_v38  ;;  %2347 = vmatpush3.bf16.msra.mxu1 %v2346_v62  ;;  %v1197_v22 = vand.u32 4294901760, %v1196_v16  ;;  %v349_v61 = vand.u32 4294901760, %v348_v21  ;;  %v481_v44 = vsub.f32 %v2867_v5, %v3642_v31 }
  0x50   :  { %v2348_v1 = vpack.c.bf16 %v468_v54, %v461_v29  ;;  %v356_v26 = vand.u32 4294901760, %v355_v58  ;;  %v475_v38 = vand.u32 4294901760, %v474_v25  ;;  %v1203_v3 = vsub.f32 %v2871_v37, %v3640_v30 }
  0x51   :  { %v3639_v32 = vand.u32 4294901760, %v2875_v15  ;;  %v2530_v50 = vpack.c.bf16 %v1197_v22, %v1190_v7  ;;  %v482_v8 = vand.u32 4294901760, %v481_v44  ;;  %v3638_v62 = vand.u32 4294901760, %v2877_v41 }
  0x52   :  { %2349 = vmatprep.subr.bf16.mxu1 %v2348_v1  ;;  %v3637_v29 = vand.u32 4294901760, %v2881_v33  ;;  %v2350_v54 = vpack.c.bf16 %v356_v26, %v349_v61  ;;  %v1204_v16 = vand.u32 4294901760, %v1203_v3  ;;  %v3641_v58 = vand.u32 4294901760, %v2885_v27  ;;  %v3715_v3 = vld [vmem:[#allocation32_spill] sm:$0xff] }
  0x53   :  { %v1210_v21 = vsub.f32 %v2875_v15, %v3639_v32  ;;  %2531 = vmatpush3.bf16.msra.mxu0 %v2530_v50  ;;  %v2352_v25 = vpack.c.bf16 %v482_v8, %v475_v38  ;;  %v362_v1 = vsub.f32 %v2877_v41, %v3638_v62  ;;  %v3643_v44 = vand.u32 4294901760, %v2888_v49  ;;  %v3716_v62 = vld [vmem:[#allocation33_spill] sm:$0xff] }
  0x54   :  { %v369_v22 = vsub.f32 %v2881_v33, %v3637_v29  ;;  %2351 = vmatpush3.bf16.msra.mxu1 %v2350_v54  ;;  %2532 = vmatprep.subr.bf16.mxu0 %v3688_v60  ;;  %v488_v26 = vsub.f32 %v2885_v27, %v3641_v58  ;;  %v3645_v8 = vand.u32 4294901760, %v2892_v10  ;;  %v3646_v50 = vand.u32 4294901760, %v3715_v3 }
  0x55   :  { %v1211_v61 = vand.u32 4294901760, %v1210_v21  ;;  %2353 = vmatprep.subr.bf16.mxu1 %v2352_v25  ;;  %v363_v7 = vand.u32 4294901760, %v362_v1  ;;  %v495_v29 = vsub.f32 %v2888_v49, %v3643_v44  ;;  %v3647_v54 = vand.u32 4294901760, %v3716_v62 }
  0x56   :  { %v370_v38 = vand.u32 4294901760, %v369_v22  ;;  %v489_v30 = vand.u32 4294901760, %v488_v26  ;;  %v1217_v21 = vsub.f32 %v2892_v10, %v3645_v8  ;;  %v1224_v58 = vsub.f32 %v3715_v3, %v3646_v50  ;;  %v3717_v26 = vld [vmem:[#allocation36_spill] sm:$0xff] }
  0x57   :  { %v2533_v32 = vpack.c.bf16 %v1211_v61, %v1204_v16  ;;  %v496_v25 = vand.u32 4294901760, %v495_v29  ;;  %v376_v1 = vsub.f32 %v3716_v62, %v3647_v54  ;;  %v3648_v22 = vand.u32 4294901760, %v2903_v9 }
  0x58   :  { %v2354_v31 = vpack.c.bf16 %v370_v38, %v363_v7  ;;  %v1218_v44 = vand.u32 4294901760, %v1217_v21  ;;  %v1225_v16 = vand.u32 4294901760, %v1224_v58  ;;  %v3649_v61 = vand.u32 4294901760, %v2907_v43  ;;  %v3718_v7 = vld [vmem:[#allocation38_spill] sm:$0xff] }
  0x59   :  { %2534 = vmatpush3.bf16.msra.mxu0 %v2533_v32  ;;  %v3650_v39 = vand.u32 4294901760, %v3717_v26  ;;  %v2356_v8 = vpack.c.bf16 %v496_v25, %v489_v30  ;;  %v377_v50 = vand.u32 4294901760, %v376_v1  ;;  %v383_v29 = vsub.f32 %v2903_v9, %v3648_v22 }
  0x5a   :  { %2355 = vmatpush3.bf16.msra.mxu1 %v2354_v31  ;;  %2535 = vmatprep.subr.bf16.mxu0 %v3688_v60  ;;  %v3654_v38 = vand.u32 4294901760, %v3718_v7  ;;  %v2536_v54 = vpack.c.bf16 %v1225_v16, %v1218_v44  ;;  %v502_v32 = vsub.f32 %v2907_v43, %v3649_v61  ;;  %v3719_v31 = vld [vmem:[#allocation39_spill] sm:$0xff]  ;;  %v3656_v1 = vand.u32 4294901760, %v2928_v14 }
  0x5b   :  { %v509_v58 = vsub.f32 %v3717_v26, %v3650_v39  ;;  %v3653_v21 = vand.u32 4294901760, %v3719_v31  ;;  %2357 = vmatprep.subr.bf16.mxu1 %v2356_v8  ;;  %v384_v30 = vand.u32 4294901760, %v383_v29  ;;  %v3663_v44 = vand.u32 4294901760, %v2930_v6 }
  0x5c   :  { %v1231_v25 = vsub.f32 %v3718_v7, %v3654_v38  ;;  %v503_v16 = vand.u32 4294901760, %v502_v32  ;;  %v3661_v39 = vand.u32 4294901760, %v2933_v17  ;;  %v390_v29 = vsub.f32 %v2928_v14, %v3656_v1 }
  0x5d   :  { %2537 = vmatpush3.bf16.msra.mxu0 %v2536_v54  ;;  %v510_v22 = vand.u32 4294901760, %v509_v58  ;;  %v1238_v61 = vsub.f32 %v3719_v31, %v3653_v21  ;;  %v2358_v42 = vpack.c.bf16 %v384_v30, %v377_v50  ;;  %v397_v54 = vsub.f32 %v2930_v6, %v3663_v44  ;;  %v3721_v44 = vld [vmem:[#allocation15_spill] sm:$0xff] }
  0x5e   :  { %2538 = vmatprep.subr.bf16.mxu0 %v3688_v60  ;;  %v1232_v8 = vand.u32 4294901760, %v1231_v25  ;;  %v516_v21 = vsub.f32 %v2933_v17, %v3661_v39  ;;  %v3660_v38 = vand.u32 4294901760, %v2939_v13  ;;  %v391_v50 = vand.u32 4294901760, %v390_v29 }
  0x5f   :  { %v2360_v32 = vpack.c.bf16 %v510_v22, %v503_v16  ;;  %v1239_v58 = vand.u32 4294901760, %v1238_v61  ;;  %2359 = vmatpush3.bf16.msra.mxu1 %v2358_v42  ;;  %v398_v30 = vand.u32 4294901760, %v397_v54  ;;  %v3659_v25 = vand.u32 4294901760, %v2943_v19 }
  0x60   :  { %v3662_v31 = vand.u32 4294901760, %v2947_v45  ;;  %v517_v14 = vand.u32 4294901760, %v516_v21  ;;  %v523_v22 = vsub.f32 %v2939_v13, %v3660_v38  ;;  %v3664_v61 = vand.u32 4294901760, %v2951_v40 }
  0x61   :  { %2361 = vmatprep.subr.bf16.mxu1 %v2360_v32  ;;  %v2539_v1 = vpack.c.bf16 %v1239_v58, %v1232_v8  ;;  %v2362_v16 = vpack.c.bf16 %v398_v30, %v391_v50  ;;  %v1245_v42 = vsub.f32 %v2943_v19, %v3659_v25  ;;  %v410_v54 = vand.u32 4294901760, %v2955_v2 }
  0x62   :  { %v1252_v29 = vsub.f32 %v2947_v45, %v3662_v31  ;;  %v524_v8 = vand.u32 4294901760, %v523_v22  ;;  %v404_v21 = vsub.f32 %v2951_v40, %v3664_v61  ;;  %v3720_v31 = vld [vmem:[#allocation13_spill] sm:$0xff] }
  0x63   :  { %2540 = vmatpush3.bf16.msra.mxu0 %v2539_v1  ;;  %2363 = vmatpush3.bf16.msra.mxu1 %v2362_v16  ;;  %v1246_v32 = vand.u32 4294901760, %v1245_v42  ;;  %v411_v50 = vsub.f32 %v2955_v2, %v410_v54  ;;  %v2368_v1 = vpack.c.bf16 %v2780_v24, %v2778_v23  ;;  %v2545_v61 = vpack.c.bf16 %v3721_v44, %v3720_v31  ;;  %v3722_v16 = vld [vmem:[#allocation17_spill] sm:$0xff] }
  0x64   :  { %2541 = vmatprep.subr.bf16.mxu0 %v3688_v60  ;;  %v1253_v58 = vand.u32 4294901760, %v1252_v29  ;;  %v2364_v30 = vpack.c.bf16 %v524_v8, %v517_v14  ;;  %v405_v25 = vand.u32 4294901760, %v404_v21  ;;  %v2370_v42 = vpack.c.bf16 %v2793_v34, %v3722_v16 }
  0x65   :  { %v412_v39 = vand.u32 4294901760, %v411_v50  ;;  %v2372_v14 = vpack.c.bf16 %v2802_v47, %v2800_v46  ;;  %v2548_v29 = vpack.c.bf16 %v2808_v53, %v2804_v48  ;;  %v2374_v8 = vpack.c.bf16 %v2815_v57, %v2812_v55 }
  0x66   :  { %v2542_v38 = vpack.c.bf16 %v1253_v58, %v1246_v32  ;;  %2365 = vmatprep.subr.bf16.mxu1 %v2364_v30  ;;  %v3724_v21 = vand.u32 4294901760, %v2778_v23  ;;  %v3725_v32 = vand.u32 4294901760, %v2780_v24  ;;  %v3726_v50 = vand.u32 4294901760, %v3720_v31 }
  0x67   :  { %v2366_v22 = vpack.c.bf16 %v412_v39, %v405_v25  ;;  %v3723_v39 = vld [vmem:[#allocation48_spill] sm:$0xff]  ;;  %v2551_v25 = vpack.c.bf16 %v2830_v18, %v2826_v12  ;;  %v3727_v30 = vand.u32 4294901760, %v3721_v44  ;;  %v3730_v23 = vand.u32 4294901760, %v2800_v46 }
  0x68   :  { %2543 = vmatpush3.bf16.msra.mxu0 %v2542_v38  ;;  %v2376_v38 = vpack.c.bf16 %v2824_v11, %v2817_v59  ;;  %v3213_v58 = vpack.c.bf16 %v3725_v32, %v3724_v21  ;;  %v3731_v24 = vand.u32 4294901760, %v2802_v47  ;;  %v3732_v21 = vld [vmem:[#allocation47_spill] sm:$0xff]  ;;  %v3733_v31 = vand.u32 4294901760, %v2804_v48 }
  0x69   :  { %2544 = vmatprep.subr.bf16.mxu0 %v3688_v60  ;;  %2367 = vmatpush3.bf16.msra.mxu1 %v2366_v22  ;;  %v3728_v22 = vand.u32 4294901760, %v3722_v16  ;;  %v3734_v44 = vand.u32 4294901760, %v2808_v53  ;;  %v3736_v16 = vand.u32 4294901760, %v2815_v57  ;;  %v3737_v46 = vand.u32 4294901760, %v2817_v59 }
  0x6a   :  { %2369 = vmatprep.subr.bf16.mxu1 %v2368_v1  ;;  %v3221_v1 = vpack.c.bf16 %v3727_v30, %v3726_v50  ;;  %v3738_v47 = vand.u32 4294901760, %v2824_v11  ;;  %v3739_v30 = vld [vmem:[#allocation49_spill] sm:$0xff]  ;;  %v3740_v48 = vand.u32 4294901760, %v2826_v12  ;;  %v3741_v53 = vand.u32 4294901760, %v2830_v18 }
  0x6b   :  { %2162 = vmatmul.mubr.f32.vlgmr.msra.gmra.mrb[0].mxu0 %v3723_v39  ;;  %v3729_v39 = vand.u32 4294901760, %v2793_v34  ;;  %v3241_v32 = vpack.c.bf16 %v3734_v44, %v3733_v31  ;;  %v3735_v34 = vand.u32 4294901760, %v2812_v55  ;;  %v3742_v55 = vand.u32 4294901760, %v2834_v20 }
  0x6c   :  { %2546 = vmatpush3.bf16.msra.mxu0 %v2545_v61  ;;  %2196 = vmatprep.mubr.msk.f32.mxu0 %vm2720_vm0, %v3714_v52  ;;  %v3233_v61 = vpack.c.bf16 %v3731_v24, %v3730_v23  ;;  %v3253_v50 = vpack.c.bf16 %v3738_v47, %v3737_v46  ;;  %v3743_v57 = vand.u32 4294901760, %v2837_v28  ;;  %v3744_v59 = vand.u32 4294901760, %v2841_v35 }
  0x6d   :  { %v3227_v2 = vpack.c.bf16 %v3729_v39, %v3728_v22  ;;  %529 = vmatmul.mubr.f32.vlgmr.msra.gmra.mrb[2].mxu1 %v3732_v21  ;;  %2547 = vmatprep.subr.bf16.mxu0 %v3688_v60  ;;  %v3247_v39 = vpack.c.bf16 %v3736_v16, %v3735_v34  ;;  %v3260_v22 = vpack.c.bf16 %v3741_v53, %v3740_v48  ;;  %v3745_v11 = vand.u32 4294901760, %v2843_v36 }
  0x6e   :  { %2371 = vmatpush3.bf16.msra.mxu1 %v2370_v42  ;;  %664 = vmatprep.mubr.f32.mxu1 %v3739_v30  ;;  %v3266_v23 = vpack.c.bf16 %v3743_v57, %v3742_v55  ;;  %v3746_v42 = vand.u32 4294901760, %v2851_v51  ;;  %v3747_v12 = vand.u32 4294901760, %v2853_v56  ;;  %v3748_v31 = vand.u32 4294901760, %v2857_v63 }
  0x6f   :  { %v3272_v24 = vpack.c.bf16 %v3745_v11, %v3744_v59  ;;  %2373 = vmatprep.subr.bf16.mxu1 %v2372_v14  ;;  %v3749_v44 = vand.u32 4294901760, %v2859_v4  ;;  %v3750_v16 = vand.u32 4294901760, %v2863_v0  ;;  %v3751_v46 = vand.u32 4294901760, %v2867_v5 }
  0x70   :  { %v3278_v18 = vpack.c.bf16 %v3747_v12, %v3746_v42  ;;  %v3752_v14 = vand.u32 4294901760, %v2871_v37  ;;  %v3753_v48 = vand.u32 4294901760, %v2875_v15  ;;  %2549 = vmatpush3.bf16.msra.mxu0 %v2548_v29  ;;  %v3754_v55 = vand.u32 4294901760, %v2877_v41 }
  0x71   :  { %v3284_v34 = vpack.c.bf16 %v3749_v44, %v3748_v31  ;;  %v3290_v47 = vpack.c.bf16 %v3751_v46, %v3750_v16  ;;  %v3755_v57 = vand.u32 4294901760, %v2881_v33  ;;  %v3757_v11 = vand.u32 4294901760, %v2885_v27  ;;  %2550 = vmatprep.subr.bf16.mxu0 %v3688_v60 }
  0x72   :  { %v3296_v53 = vpack.c.bf16 %v3753_v48, %v3752_v14  ;;  %v3758_v42 = vand.u32 4294901760, %v2888_v49  ;;  %v3760_v31 = vand.u32 4294901760, %v2892_v10  ;;  %v3761_v44 = vand.u32 4294901760, %v3715_v3  ;;  %2375 = vmatpush3.bf16.msra.mxu1 %v2374_v8 }
  0x73   :  { %v3302_v59 = vpack.c.bf16 %v3755_v57, %v3754_v55  ;;  %v3763_v29 = vand.u32 4294901760, %v3716_v62  ;;  %v3764_v46 = vand.u32 4294901760, %v2903_v9  ;;  %v3766_v48 = vand.u32 4294901760, %v2907_v43  ;;  %2377 = vmatprep.subr.bf16.mxu1 %v2376_v38  ;;  %v3797_v38 = vld [vmem:[#allocation28_spill] sm:$0xff] }
  0x74   :  { %v3308_v12 = vpack.c.bf16 %v3758_v42, %v3757_v11  ;;  %v3314_v16 = vpack.c.bf16 %v3761_v44, %v3760_v31  ;;  %v3767_v55 = vand.u32 4294901760, %v3717_v26  ;;  %v3768_v11 = vand.u32 4294901760, %v3718_v7  ;;  %v3769_v42 = vld [vmem:[#allocation39_spill] sm:$0xff]  ;;  %v3772_v44 = vld [vmem:[#allocation41_spill] sm:$0xff]  ;;  %2552 = vmatpush3.bf16.msra.mxu0 %v2551_v25 }
  0x75   :  { %3756 = vst [vmem:[#allocation32_spill] sm:$0xff] %v3302_v59  ;;  %v3320_v14 = vpack.c.bf16 %v3764_v46, %v3763_v29  ;;  %v3770_v21 = vand.u32 4294901760, %v3769_v42  ;;  %v3775_v46 = vand.u32 4294901760, %v2933_v17  ;;  %v2554_v8 = vpack.c.bf16 %v2853_v56, %v2851_v51  ;;  %2553 = vmatprep.subr.bf16.mxu0 %v3688_v60  ;;  %v3798_v25 = vld [vmem:[#allocation29_spill] sm:$0xff] }
  0x76   :  { %3759 = vst [vmem:[#allocation33_spill] sm:$0xff] %v3308_v12  ;;  %3762 = vst [vmem:[#allocation36_spill] sm:$0xff] %v3314_v16  ;;  %v3327_v57 = vpack.c.bf16 %v3767_v55, %v3766_v48  ;;  %v3773_v16 = vand.u32 4294901760, %v3772_v44  ;;  %v3774_v12 = vand.u32 4294901760, %v2930_v6  ;;  %v2378_v48 = vpack.c.bf16 %v2837_v28, %v2834_v20 }
  0x77   :  { %3765 = vst [vmem:[#allocation38_spill] sm:$0xff] %v3320_v14  ;;  %v3333_v31 = vpack.c.bf16 %v3770_v21, %v3768_v11  ;;  %v3776_v14 = vand.u32 4294901760, %v2939_v13  ;;  %v3777_v55 = vand.u32 4294901760, %v2943_v19  ;;  %v3778_v21 = vand.u32 4294901760, %v2947_v45 }
  0x78   :  { %v3339_v29 = vpack.c.bf16 %v3774_v12, %v3773_v16  ;;  %v2380_v16 = vpack.c.bf16 %v2843_v36, %v2841_v35  ;;  %2379 = vmatpush3.bf16.msra.mxu1 %v2378_v48  ;;  %v2382_v20 = vpack.c.bf16 %v2859_v4, %v2857_v63  ;;  %v2384_v28 = vpack.c.bf16 %v2867_v5, %v2863_v0  ;;  %v3780_v5 = vld [vmem:[#allocation45_spill] sm:$0xff]  ;;  %v3805_v48 = vld [vmem:[#allocation42_spill] sm:$0xff] }
  0x79   :  { %3771 = vst [vmem:[#allocation13_spill] sm:$0xff] %v3333_v31  ;;  %v3345_v59 = vpack.c.bf16 %v3776_v14, %v3775_v46  ;;  %v3353_v11 = vpack.c.bf16 %v3778_v21, %v3777_v55  ;;  %v3779_v31 = vand.u32 4294901760, %v2951_v40  ;;  %2555 = vmatpush3.bf16.msra.mxu0 %v2554_v8  ;;  %v2386_v35 = vpack.c.bf16 %v2881_v33, %v2877_v41  ;;  %v3782_v41 = vld [vmem:[#allocation51_spill] sm:$0xff]  ;;  %v3804_v46 = vld [vmem:[#allocation40_spill] sm:$0xff] }
  0x7a   :  { %2381 = vmatprep.subr.bf16.mxu1 %v2380_v16  ;;  %2556 = vmatprep.subr.bf16.mxu0 %v3688_v60  ;;  %v2388_v36 = vpack.c.bf16 %v2888_v49, %v2885_v27  ;;  %v2560_v51 = vpack.c.bf16 %v3715_v3, %v2892_v10  ;;  %v2390_v0 = vpack.c.bf16 %v2903_v9, %v3716_v62  ;;  %v3785_v27 = vld [vmem:[#allocation16_spill] sm:$0xff]  ;;  %v3786_v49 = vand.u32 4294901760, %v3739_v30  ;;  %v3787_v9 = vld [vmem:[#allocation18_spill] sm:$0xff]  ;;  %v3794_v3 = vld [vmem:[#allocation25_spill] sm:$0xff] }
  0x7b   :  { %v3357_v12 = vpack.c.bf16 %v410_v54, %v3779_v31  ;;  %v2557_v54 = vpack.c.bf16 %v2875_v15, %v2871_v37  ;;  %v2392_v56 = vpack.c.bf16 %v3717_v26, %v2907_v43  ;;  %v2563_v33 = vpack.c.bf16 %v3769_v42, %v3718_v7  ;;  %v3781_v15 = vld [vmem:[#allocation12_spill] sm:$0xff]  ;;  %v3784_v43 = vld [vmem:[#allocation50_spill] sm:$0xff]  ;;  %v3796_v7 = vld [vmem:[#allocation27_spill] sm:$0xff] }
  0x7c   :  { %2383 = vmatpush3.bf16.msra.mxu1 %v2382_v20  ;;  %v2394_v10 = vpack.c.bf16 %v2930_v6, %v3772_v44  ;;  %v2396_v63 = vpack.c.bf16 %v2939_v13, %v2933_v17  ;;  %v2566_v4 = vpack.c.bf16 %v2947_v45, %v2943_v19  ;;  %v2398_v37 = vpack.c.bf16 %v3780_v5, %v2951_v40  ;;  %v3783_v17 = vld [vmem:[#allocation14_spill] sm:$0xff]  ;;  %v3788_v6 = vld [vmem:[#allocation19_spill] sm:$0xff]  ;;  %v3789_v13 = vld [vmem:[#allocation20_spill] sm:$0xff] }
  0x7d   :  { %2385 = vmatprep.subr.bf16.mxu1 %v2384_v28  ;;  %2558 = vmatpush3.bf16.msra.mxu0 %v2557_v54  ;;  %v3790_v19 = vld [vmem:[#allocation21_spill] sm:$0xff]  ;;  %v3791_v45 = vld [vmem:[#allocation22_spill] sm:$0xff]  ;;  %v3792_v40 = vld [vmem:[#allocation23_spill] sm:$0xff]  ;;  %v3808_v16 = vand.u32 4294901760, %v3782_v41  ;;  %v3809_v8 = vand.u32 4294901760, %v3784_v43 }
  0x7e   :  { %2559 = vmatprep.subr.bf16.mxu0 %v3688_v60  ;;  %v3793_v62 = vld [vmem:[#allocation24_spill] sm:$0xff]  ;;  %v3795_v26 = vld [vmem:[#allocation26_spill] sm:$0xff]  ;;  %v3800_v14 = vld [vmem:[#allocation31_spill] sm:$0xff] }
  0x7f   :  { %v3799_v30 = vld [vmem:[#allocation30_spill] sm:$0xff]  ;;  %v3802_v31 = vld [vmem:[#allocation35_spill] sm:$0xff]  ;;  %v3803_v44 = vld [vmem:[#allocation37_spill] sm:$0xff] }
  0x80   :  { %2387 = vmatpush3.bf16.msra.mxu1 %v2386_v35  ;;  %v3801_v42 = vld [vmem:[#allocation34_spill] sm:$0xff]  ;;  %v3806_v55 = vld [vmem:[#allocation43_spill] sm:$0xff]  ;;  %v3807_v21 = vld [vmem:[#allocation44_spill] sm:$0xff] }
  0x81   :  { %2389 = vmatprep.subr.bf16.mxu1 %v2388_v36  ;;  %2561 = vmatpush3.bf16.msra.mxu0 %v2560_v51  ;;  %v3810_v20 = vld [vmem:[#allocation46_spill] sm:$0xff] }
  0x82   :  { %2562 = vmatprep.subr.bf16.mxu0 %v3688_v60 }
  0x84   :  { %2391 = vmatpush3.bf16.msra.mxu1 %v2390_v0 }
  0x85   :  { %2393 = vmatprep.subr.bf16.mxu1 %v2392_v56  ;;  %2564 = vmatpush3.bf16.msra.mxu0 %v2563_v33 }
  0x86   :  { %2565 = vmatprep.subr.bf16.mxu0 %v3688_v60 }
  0x88   :  { %2395 = vmatpush3.bf16.msra.mxu1 %v2394_v10 }
  0x89   :  { %2397 = vmatprep.subr.bf16.mxu1 %v2396_v63  ;;  %2567 = vmatpush3.bf16.msra.mxu0 %v2566_v4 }
  0x8a   :  { %2568 = vmatprep.subr.bf16.mxu0 %v3688_v60 }
  0x8c   :  { %2399 = vmatpush3.bf16.msra.mxu1 %v2398_v37  ;;  %2197 = vmatmul.mubr.f32.vlgmr.msra.gmra.mrb[0].mxu0 %v3782_v41 }
  0x8d   :  { %2401 = vmatprep.subr.bf16.mxu1 %v3781_v15  ;;  %2570 = vmatpush3.bf16.msra.mxu0 %v3783_v17 }
  0x8e   :  { %2231 = vmatprep.mubr.msk.f32.mxu0 %vm2720_vm0, %v3714_v52  ;;  %2571 = vmatprep.subr.bf16.mxu0 %v3688_v60 }
  0x8f   :  { %667 = vmatmul.mubr.f32.vlgmr.msra.gmra.mrb[4].mxu1 %v3784_v43 }
  0x90   :  { %2403 = vmatpush3.bf16.msra.mxu1 %v3785_v27  ;;  %771 = vmatprep.mubr.f32.mxu1 %v3786_v49 }
  0x91   :  { %2405 = vmatprep.subr.bf16.mxu1 %v3787_v9  ;;  %2573 = vmatpush3.bf16.msra.mxu0 %v3788_v6 }
  0x92   :  { %2574 = vmatprep.subr.bf16.mxu0 %v3688_v60 }
  0x94   :  { %2407 = vmatpush3.bf16.msra.mxu1 %v3789_v13 }
  0x95   :  { %2409 = vmatprep.subr.bf16.mxu1 %v3790_v19  ;;  %2576 = vmatpush3.bf16.msra.mxu0 %v3791_v45 }
  0x96   :  { %2577 = vmatprep.subr.bf16.mxu0 %v3688_v60 }
  0x98   :  { %2411 = vmatpush3.bf16.msra.mxu1 %v3792_v40 }
  0x99   :  { %2413 = vmatprep.subr.bf16.mxu1 %v3793_v62  ;;  %2579 = vmatpush3.bf16.msra.mxu0 %v3794_v3 }
  0x9a   :  { %2580 = vmatprep.subr.bf16.mxu0 %v3688_v60 }
  0x9c   :  { %2415 = vmatpush3.bf16.msra.mxu1 %v3795_v26 }
  0x9d   :  { %2417 = vmatprep.subr.bf16.mxu1 %v3796_v7  ;;  %2582 = vmatpush3.bf16.msra.mxu0 %v3797_v38 }
  0x9e   :  { %2583 = vmatprep.subr.bf16.mxu0 %v3688_v60 }
  0xa0   :  { %2419 = vmatpush3.bf16.msra.mxu1 %v3798_v25 }
  0xa1   :  { %2421 = vmatprep.subr.bf16.mxu1 %v3799_v30  ;;  %2585 = vmatpush3.bf16.msra.mxu0 %v3800_v14 }
  0xa2   :  { %2586 = vmatprep.subr.bf16.mxu0 %v3688_v60 }
  0xa4   :  { %2423 = vmatpush3.bf16.msra.mxu1 %v3801_v42 }
  0xa5   :  { %2425 = vmatprep.subr.bf16.mxu1 %v3802_v31  ;;  %2588 = vmatpush3.bf16.msra.mxu0 %v3803_v44 }
  0xa6   :  { %2589 = vmatprep.subr.bf16.mxu0 %v3688_v60 }
  0xa8   :  { %2427 = vmatpush3.bf16.msra.mxu1 %v3804_v46 }
  0xa9   :  { %2429 = vmatprep.subr.bf16.mxu1 %v3805_v48  ;;  %2591 = vmatpush3.bf16.msra.mxu0 %v3806_v55 }
  0xaa   :  { %2592 = vmatprep.subr.bf16.mxu0 %v3688_v60 }
  0xac   :  { %2431 = vmatpush3.bf16.msra.mxu1 %v3807_v21  ;;  %2232 = vmatmul.mubr.f32.vlgmr.msra.gmra.mrb[0].mxu0 %v3808_v16 }
  0xad   :  { %2433 = vmatprep.subr.bf16.mxu1 %v3213_v58  ;;  %2594 = vmatpush3.bf16.msra.mxu0 %v3221_v1  ;;  %v3812_v58 = vld [vmem:[#allocation33_spill] sm:$0xff]  ;;  %v3813_v1 = vld [vmem:[#allocation36_spill] sm:$0xff] }
  0xae   :  { %2266 = vmatprep.mubr.msk.f32.mxu0 %vm2720_vm0, %v3714_v52  ;;  %2595 = vmatprep.subr.bf16.mxu0 %v3688_v60 }
  0xaf   :  { %775 = vmatmul.mubr.f32.vlgmr.msra.gmra.mrb[6].mxu1 %v3809_v8 }
  0xb0   :  { %2435 = vmatpush3.bf16.msra.mxu1 %v3227_v2  ;;  %941 = vmatprep.mubr.f32.mxu1 %v3810_v20  ;;  %v3811_v2 = vld [vmem:[#allocation32_spill] sm:$0xff] }
  0xb1   :  { %2437 = vmatprep.subr.bf16.mxu1 %v3233_v61  ;;  %2597 = vmatpush3.bf16.msra.mxu0 %v3241_v32  ;;  %v3814_v61 = vld [vmem:[#allocation38_spill] sm:$0xff]  ;;  %v3815_v32 = vld [vmem:[#allocation13_spill] sm:$0xff] }
  0xb2   :  { %2598 = vmatprep.subr.bf16.mxu0 %v3688_v60 }
  0xb4   :  { %2439 = vmatpush3.bf16.msra.mxu1 %v3247_v39  ;;  %v3816_v39 = vld [vmem:[#allocation48_spill] sm:$0xff] }
  0xb5   :  { %2441 = vmatprep.subr.bf16.mxu1 %v3253_v50  ;;  %2600 = vmatpush3.bf16.msra.mxu0 %v3260_v22  ;;  %v3817_v50 = vld [vmem:[#allocation47_spill] sm:$0xff] }
  0xb6   :  { %2601 = vmatprep.subr.bf16.mxu0 %v3688_v60 }
  0xb8   :  { %2443 = vmatpush3.bf16.msra.mxu1 %v3266_v23 }
  0xb9   :  { %2445 = vmatprep.subr.bf16.mxu1 %v3272_v24  ;;  %2603 = vmatpush3.bf16.msra.mxu0 %v3278_v18 }
  0xba   :  { %2604 = vmatprep.subr.bf16.mxu0 %v3688_v60 }
  0xbc   :  { %2447 = vmatpush3.bf16.msra.mxu1 %v3284_v34 }
  0xbd   :  { %2449 = vmatprep.subr.bf16.mxu1 %v3290_v47  ;;  %2606 = vmatpush3.bf16.msra.mxu0 %v3296_v53 }
  0xbe   :  { %2607 = vmatprep.subr.bf16.mxu0 %v3688_v60 }
  0xc0   :  { %2451 = vmatpush3.bf16.msra.mxu1 %v3811_v2 }
  0xc1   :  { %2453 = vmatprep.subr.bf16.mxu1 %v3812_v58  ;;  %2609 = vmatpush3.bf16.msra.mxu0 %v3813_v1 }
  0xc2   :  { %2610 = vmatprep.subr.bf16.mxu0 %v3688_v60 }
  0xc4   :  { %2455 = vmatpush3.bf16.msra.mxu1 %v3814_v61 }
  0xc5   :  { %2457 = vmatprep.subr.bf16.mxu1 %v3327_v57  ;;  %2612 = vmatpush3.bf16.msra.mxu0 %v3815_v32 }
  0xc6   :  { %2613 = vmatprep.subr.bf16.mxu0 %v3688_v60 }
  0xc8   :  { %2459 = vmatpush3.bf16.msra.mxu1 %v3339_v29 }
  0xc9   :  { %2461 = vmatprep.subr.bf16.mxu1 %v3345_v59  ;;  %2615 = vmatpush3.bf16.msra.mxu0 %v3353_v11  ;;  %v3819_v59 = vld [vmem:[#allocation11_spill] sm:$0xff]  ;;  %v1706_v11 = vld [vmem:[%s3535_s3] sm:$0x1] }
  0xca   :  { %2616 = vmatprep.subr.bf16.mxu0 %v3688_v60  ;;  %v1703_v57 = vmul.u32 128, %v3819_v59 }
  0xcc   :  { %2463 = vmatpush3.bf16.msra.mxu1 %v3357_v12  ;;  %2267 = vmatmul.mubr.f32.vlgmr.msra.gmra.mrb[0].mxu0 %v3816_v39  ;;  %v1713_v12 = vld [vmem:[#allocation3] sm:$0x1] }
  0xcd   :  { %2465 = vmatprep.subr.bf16.mxu1 %v3781_v15  ;;  %2618 = vmatpush3.bf16.msra.mxu0 %v3783_v17 }
  0xce   :  { %2301 = vmatprep.mubr.msk.f32.mxu0 %vm2720_vm0, %v3714_v52  ;;  %2619 = vmatprep.subr.bf16.mxu0 %v3688_v60 }
  0xcf   :  { %943 = vmatmul.mubr.f32.vlgmr.msra.gmra.mrb[8].mxu1 %v3817_v50 }
  0xd0   :  { %2467 = vmatpush3.bf16.msra.mxu1 %v3785_v27  ;;  %1045 = vmatprep.mubr.f32.mxu1 %v3810_v20 }
  0xd1   :  { %2469 = vmatprep.subr.bf16.mxu1 %v3787_v9  ;;  %2621 = vmatpush3.bf16.msra.mxu0 %v3788_v6  ;;  %v1693_v6 = vstv %s3532_s0 }
  0xd2   :  { %2622 = vmatprep.subr.bf16.mxu0 %v3688_v60 }
  0xd4   :  { %2471 = vmatpush3.bf16.msra.mxu1 %v3789_v13 }
  0xd5   :  { %2473 = vmatprep.subr.bf16.mxu1 %v3790_v19  ;;  %2624 = vmatpush3.bf16.msra.mxu0 %v3791_v45 }
  0xd6   :  { %2625 = vmatprep.subr.bf16.mxu0 %v3688_v60 }
  0xd8   :  { %2475 = vmatpush3.bf16.msra.mxu1 %v3792_v40 }
  0xd9   :  { %2477 = vmatprep.subr.bf16.mxu1 %v3793_v62  ;;  %2627 = vmatpush3.bf16.msra.mxu0 %v3794_v3  ;;  %v1707_v62 = vld [vmem:[#allocation2] sm:$0x1] }
  0xda   :  { %2628 = vmatprep.subr.bf16.mxu0 %v3688_v60 }
  0xdc   :  { %2479 = vmatpush3.bf16.msra.mxu1 %v3795_v26 }
  0xdd   :  { %2481 = vmatprep.subr.bf16.mxu1 %v3796_v7  ;;  %2630 = vmatpush3.bf16.msra.mxu0 %v3797_v38 }
  0xde   :  { %2631 = vmatprep.subr.bf16.mxu0 %v3688_v60 }
  0xe0   :  { %2483 = vmatpush3.bf16.msra.mxu1 %v3798_v25 }
  0xe1   :  { %2485 = vmatprep.subr.bf16.mxu1 %v3799_v30  ;;  %2633 = vmatpush3.bf16.msra.mxu0 %v3800_v14 }
  0xe2   :  { %2634 = vmatprep.subr.bf16.mxu0 %v3688_v60 }
  0xe4   :  { %2487 = vmatpush3.bf16.msra.mxu1 %v3801_v42 }
  0xe5   :  { %2489 = vmatprep.subr.bf16.mxu1 %v3802_v31  ;;  %2636 = vmatpush3.bf16.msra.mxu0 %v3803_v44 }
  0xe6   :  { %2637 = vmatprep.subr.bf16.mxu0 %v3688_v60  ;;  %v3818_v60 = vlaneseq }
  0xe8   :  { %2491 = vmatpush3.bf16.msra.mxu1 %v3804_v46  ;;  %v1702_v53 = vand.u32 127, %v3818_v60 }
  0xe9   :  { %2493 = vmatprep.subr.bf16.mxu1 %v3805_v48  ;;  %2639 = vmatpush3.bf16.msra.mxu0 %v3806_v55 }
  0xea   :  { %v1704_v29 = vadd.s32 %v1703_v57, %v1702_v53 }
  0xec   :  { %2495 = vmatpush3.bf16.msra.mxu1 %v3807_v21  ;;  %2302 = vmatmul.mubr.f32.vlgmr.msra.gmra.mrb[0].mxu0 %v3816_v39  ;;  %vm1705_vm1 = vcmp.lt.s32.totalorder %v1704_v29, 128 }
  0xed   :  { %v1714_v28 = vsel %vm1705_vm1, %v1706_v11, 0.0 }
  0xee   :  { %v1716_v54 = vadd.f32 %v1714_v28, %v1713_v12 }
  0xef   :  { %1047 = vmatmul.mubr.f32.vlgmr.msra.gmra.mrb[10].mxu1 %v3817_v50 }
  0xf0   :  { %1717 = vst [vmem:[#allocation3] sm:$0x1] %v1716_v54 }
  0xf7   :  { %v1733_v25 = vld [vmem:[#allocation3] sm:$0x1] }
  0xf8   :  { %v1734_v14 = vsel %vm1722_vm2, %v1733_v25, 0.0 }
 0x118   :  { %v1814_v52 = vpop.f32.mrb[0].mxu1 }
 0x119   :  { %v1815_v22 = vpop.f32.mrb[1].mxu1 }
 0x11a   :  { %v1816_v23 = vadd.f32 %v1815_v22, %v1814_v52 }
 0x140   :  { %v1849_v24 = vpop.f32.mrb[2].mxu1 }
 0x141   :  { %v1850_v18 = vpop.f32.mrb[3].mxu1 }
 0x142   :  { %v1851_v34 = vadd.f32 %v1850_v18, %v1849_v24 }
 0x144   :  { %v531_v47 = vadd.f32 %v1851_v34, %v1816_v23 }
 0x162   :  { %v1884_v35 = vpop.f32.mrb[4].mxu1 }
 0x163   :  { %v1885_v36 = vpop.f32.mrb[5].mxu1 }
 0x164   :  { %v1886_v51 = vadd.f32 %v1885_v36, %v1884_v35 }
 0x166   :  { %v669_v0 = vadd.f32 %v1886_v51, %v531_v47 }
 0x182   :  { %v1919_v56 = vpop.f32.mrb[6].mxu1 }
 0x183   :  { %v1920_v33 = vpop.f32.mrb[7].mxu1 }
 0x184   :  { %v1921_v10 = vadd.f32 %v1920_v33, %v1919_v56 }
 0x186   :  { %v777_v63 = vadd.f32 %v1921_v10, %v669_v0 }
 0x1a2   :  { %v1954_v4 = vpop.f32.mrb[8].mxu1 }
 0x1a3   :  { %v1955_v5 = vpop.f32.mrb[9].mxu1 }
 0x1a4   :  { %v1956_v37 = vadd.f32 %v1955_v5, %v1954_v4 }
 0x1a6   :  { %v945_v15 = vadd.f32 %v1956_v37, %v777_v63 }
 0x1bf   :  { %v1689_v41 = vpop.f32.mrb[0].mxu0 }
 0x1c0   :  { %v2303_v17 = vpop.f32.mrb[1].mxu0 }
 0x1c2   :  { %v1989_v43 = vpop.f32.mrb[10].mxu1 }
 0x1c3   :  { %v1990_v27 = vpop.f32.mrb[11].mxu1 }
 0x1c4   :  { %v1991_v49 = vadd.f32 %v1990_v27, %v1989_v43 }
 0x1c6   :  { %v1049_v9 = vadd.f32 %v1991_v49, %v945_v15 }
 0x1c8   :  { %v2640_v13 = vadd.f32 %v1689_v41, %v1049_v9 }
 0x1ca   :  { %v1694_v19 = vadd.f32 %v2640_v13, %v1693_v6 }
 0x1cc   :  { %2664 = vrcp.f32 %v1694_v19 }
 0x1d6   :  { %v2665_v45 = vpop.eup %2664 }
 0x1d7   :  { %v1696_v40 = vmul.f32 %v2665_v45, %v2640_v13 }
 0x1d9   :  { %v1708_v3 = vmul.f32 %v1706_v11, %v1696_v40 }
 0x1db   :  { %v1709_v26 = vsel %vm1705_vm1, %v1708_v3, 0.0 }
 0x1dc   :  { %v1711_v7 = vadd.f32 %v1709_v26, %v1707_v62 }
 0x1de   :  { %1712 = vst [vmem:[#allocation2] sm:$0x1] %v1711_v7 }
 0x1e5   :  { %v1721_v38 = vld [vmem:[#allocation2] sm:$0x1] }
 0x1e6   :  { %v1723_v30 = vsel %vm1722_vm2, %v1721_v38, 0.0 }
 0x1e7   :  { %1724 = vadd.xlane.f32.xlu0 %v1723_v30 }
 0x1eb   :  { %1735 = vadd.xlane.f32.xlu0 %v1734_v14 }
 0x274   :  { %v1725_v42 = vpop.xlane.xlu0 %1724 }
 0x275   :  { %v1726_v31 = vrot.slane %v1725_v42, 4 }
 0x277   :  { %v1727_v44 = vadd.f32 %v1726_v31, %v1725_v42 }
 0x278   :  { %v1736_v46 = vpop.xlane.xlu0 %1735 }
 0x279   :  { %v1728_v48 = vrot.slane %v1727_v44, 2  ;;  %v1737_v55 = vrot.slane %v1736_v46, 4 }
 0x27b   :  { %v1738_v21 = vadd.f32 %v1737_v55, %v1736_v46  ;;  %v1729_v16 = vadd.f32 %v1728_v48, %v1727_v44 }
 0x27d   :  { %v1739_v8 = vrot.slane %v1738_v21, 2  ;;  %v1730_v20 = vrot.slane %v1729_v16, 1 }
 0x27f   :  { %v1740_v2 = vadd.f32 %v1739_v8, %v1738_v21  ;;  %v1731_v58 = vadd.f32 %v1730_v20, %v1729_v16 }
 0x281   :  { %2651 = vpush %v1731_v58  ;;  %v1741_v1 = vrot.slane %v1740_v2, 1 }
 0x283   :  { %v1742_v61 = vadd.f32 %v1741_v1, %v1740_v2 }
 0x285   :  { %2653 = vpush %v1742_v61 }
 0x2b2   :  { %s2652_s0 = spop %2651 }
 0x2b6   :  { %s2654_s11 = spop %2653 }
 0x2b7   :  { %s1744_s12 = sadd.f32 1e-05, %s2654_s11 }
 0x2b9   :  { %v1745_v32 = vstv %s1744_s12 }
 0x2ba   :  { %2666 = vrcp.f32 %v1745_v32 }
 0x2c4   :  { %v2667_v39 = vpop.eup %2666 }
 0x2c5   :  { %2655 = vpush %v2667_v39 }
 0x2f6   :  { %s2656_s15 = spop %2655 }
 0x2f7   :  { %s1748_s16 = smul.f32 %s2656_s15, %s2652_s0 }
 0x2f9   :  { %v1749_v50 = vstv %s1748_s16 }
 0x2fa   :  { %1751 = vst [vmem:[#allocation8] sm:$0x3] %v1749_v50 }
 0x2fb   :  { %2701 = shalt.err (!%p2698_p12)
}
 0x2fc   :  { %s2702_s20 = scalar_lea.hbm %s3537_s5, 32 }
 0x2fd   :  { %p2703_p13 = scmp.ne.s32.totalorder %s3537_s5, %s2702_s20  ;;  %p2706_p0 = scmp.lt.u32.totalorder %s2702_s20, %s3537_s5 }
 0x2ff   :  { %p2708_p1 = pnand %p2706_p0, %p2703_p13 }
 0x301   :  { %2711 = shalt.err (!%p2708_p1)
}
 0x302   :  { %1761 = dma.vmem_to_hbm [thread:$0]  %s1759_s14, 32, %s3537_s5, [#allocation7]  }
 0x303   :  { %2714 = dma.done.wait [#allocation7], 32  }
 0x304   :  { %2715 = vsyncadd [#allocation7], 4294967264 }
 0x305   :  { %1765 = vsyncpa [#allocation6], 1 }
 0x306   :  { %1766 = vsyncpa [#allocation7], 1 }

</bundles_post_ra>
